<compile_context>
chip_gen: v6e
topology: v6e:2x2x1
jax: 0.10.0
libtpu: 0.0.40
codegen_flags: <defaults>
</compile_context>

<pallas_src>
import math
import functools

import jax
import jax.numpy as jnp
from jax.experimental import pallas as pl
from jax.experimental.pallas import tpu as pltpu

# bf16 weight streaming (f32 accumulation).  Set to jnp.float32 for exact
# parity with the f32 PyTorch reference.
WEIGHT_DTYPE = jnp.bfloat16
# Number of batch blocks on the encoder's leading "parallel" grid axis.
# 2 keeps v7x's second TensorCore busy; use 1 for tiny-batch, weight-DMA-bound
# runs on single-TensorCore chips (weights are re-streamed per batch block).
ENCODER_BATCH_SPLIT = 2


def _round_up(x, m):
    return ((x + m - 1) // m) * m


@functools.lru_cache()
def _vmem_limit_bytes():
    """~half of physical VMEM: 64 MiB on v5e/v6e (128 MiB), 32 MiB on v7x (64 MiB)."""
    try:
        cap = int(pltpu.get_tpu_info().vmem_capacity_bytes)
    except Exception:
        cap = 128 * 1024 * 1024
    return int(min(64 * 1024 * 1024, max(32 * 1024 * 1024, cap // 2)))


def _vocab_pad(V):
    """Vocab tile (multiple of 128, <= 2048 for v7x VMEM) and padded vocab size."""
    vt = min(2048, _round_up(V, 128))
    return vt, _round_up(V, vt)


# ----------------------------------------------------------------------------
# Fused transformer-encoder stack (all layers, one pallas_call)
# ----------------------------------------------------------------------------
def fused_encoder_kernel(x_ref, bias_ref,
                         wq_ref, wk_ref, wv_ref, wo_ref, w1_ref, w2_ref,
                         vecs_ref, h_ref, attn_ref, ctx_sc, *, nhead):
    """One (batch_tile, layer) grid step.

    x_ref / h_ref : (R, E) rows = batch_tile * L; h_ref is the resident
                    activation (same block across the layer axis).
    bias_ref      : (bt, L, L) additive attention mask (-1e30 where masked).
    wq..w2        : per-layer weight slabs, leading dim 1 (current layer), bf16.
    vecs_ref      : (1, 10, max(E,F)) packed per-layer vectors, f32:
                    [bq, bk, bv, bo, b1, b2, g1, be1, g2, be2].
    attn_ref      : (1, bt, L, Lpad) lane-dense head-averaged attention weights.
    ctx_sc        : (R, E) VMEM scratch for the per-head context writes.
    """
    layer = pl.program_id(1)

    # Layer 0 of each batch tile: load embedded input into the resident block.
    @pl.when(layer == 0)
    def _():
        h_ref[...] = x_ref[...]

    x = h_ref[...]                                    # (R, E) f32
    R, E = x.shape
    bt, L, _ = bias_ref.shape
    F = w1_ref.shape[-1]
    hd = E // nhead
    scale = 1.0 / math.sqrt(hd)
    cdt = wq_ref.dtype                                # matmul operand dtype (bf16)

    # Single DMA'd slab of the ten per-layer vectors; static row/lane slices.
    vecs = vecs_ref[0]                                # (10, max(E, F)) f32
    bq = vecs[0:1, :E]
    bk = vecs[1:2, :E]
    bv = vecs[2:3, :E]
    bo = vecs[3:4, :E]
    b1 = vecs[4:5, :F]
    b2 = vecs[5:6, :E]
    g1 = vecs[6:7, :E]
    be1 = vecs[7:8, :E]
    g2 = vecs[8:9, :E]
    be2 = vecs[9:10, :E]

    # ---- merged-head projections: three full-width MXU matmuls -------------
    xc = x.astype(cdt)
    q = (jnp.dot(xc, wq_ref[0], preferred_element_type=jnp.float32) + bq) * scale
    k = jnp.dot(xc, wk_ref[0], preferred_element_type=jnp.float32) + bk
    v = jnp.dot(xc, wv_ref[0], preferred_element_type=jnp.float32) + bv

    q3 = q.reshape(bt, L, E)
    k3 = k.reshape(bt, L, E)
    v3 = v.reshape(bt, L, E)
    bias = bias_ref[...]                              # (bt, L, L)

    attn_sum = jnp.zeros((bt, L, L), jnp.float32)
    # Static unroll over heads; per-head context is written straight into the
    # (R, E) scratch at its static lane offset (no lane-axis concat / long
    # live ranges).  Exact softmax division: the attn weights are an output.
    for h in range(nhead):
        lo = h * hd
        s = jnp.einsum('bqd,bkd->bqk', q3[..., lo:lo + hd], k3[..., lo:lo + hd],
                       preferred_element_type=jnp.float32) + bias
        s = s - jnp.max(s, axis=-1, keepdims=True)
        p = jnp.exp(s)
        p = p / jnp.sum(p, axis=-1, keepdims=True)
        attn_sum = attn_sum + p
        ctxh = jnp.einsum('bqk,bkd->bqd', p, v3[..., lo:lo + hd],
                          preferred_element_type=jnp.float32)
        ctx_sc[:, lo:lo + hd] = ctxh.reshape(R, hd)

    # ---- head-averaged attention weights: partial store into padded block --
    attn_ref[0, :, :, :L] = attn_sum * (1.0 / nhead)

    # ---- merged output projection -------------------------------------------
    a = jnp.dot(ctx_sc[...].astype(cdt), wo_ref[0],
                preferred_element_type=jnp.float32) + bo

    # ---- residual + LayerNorm 1 ---------------------------------------------
    x1 = x + a
    mu = jnp.mean(x1, axis=-1, keepdims=True)
    var = jnp.mean((x1 - mu) ** 2, axis=-1, keepdims=True)
    x1n = (x1 - mu) * jax.lax.rsqrt(var + 1e-5) * g1 + be1

    # ---- feed-forward (relu) + residual + LayerNorm 2 -----------------------
    f = jnp.maximum(
        jnp.dot(x1n.astype(cdt), w1_ref[0],
                preferred_element_type=jnp.float32) + b1, 0.0)
    f2 = jnp.dot(f.astype(cdt), w2_ref[0],
                 preferred_element_type=jnp.float32) + b2
    x2 = x1n + f2
    mu2 = jnp.mean(x2, axis=-1, keepdims=True)
    var2 = jnp.mean((x2 - mu2) ** 2, axis=-1, keepdims=True)
    h_ref[...] = (x2 - mu2) * jax.lax.rsqrt(var2 + 1e-5) * g2 + be2


def fused_encoder(x, bias, enc, nhead):
    """x: (B, L, E), bias: (B, L, L) additive mask.
    Returns hidden (B, L, E) and attns (nlayers, B, L, L)."""
    B, L, E = x.shape
    nlayers = enc['wq'].shape[0]
    F = enc['w1'].shape[2]
    Fmax = enc['vecs'].shape[-1]
    Lpad = _round_up(L, 128)                  # lane-dense attention output
    # Split the batch axis so the second TensorCore (v7x) gets a block.
    n_bt = ENCODER_BATCH_SPLIT if (B % ENCODER_BATCH_SPLIT == 0
                                   and B >= ENCODER_BATCH_SPLIT) else 1
    bt = B // n_bt
    R = bt * L
    x2d = x.reshape(B * L, E)

    rows_spec = pl.BlockSpec((R, E), lambda b, l: (b, 0))

    def wspec(d1, d2):
        return pl.BlockSpec((1, d1, d2), lambda b, l: (l, 0, 0))

    kern = functools.partial(fused_encoder_kernel, nhead=nhead)
    hidden2d, attn_pad = pl.pallas_call(
        kern,
        grid=(n_bt, nlayers),
        in_specs=[
            rows_spec,                                          # x rows
            pl.BlockSpec((bt, L, L), lambda b, l: (b, 0, 0)),   # additive mask
            wspec(E, E), wspec(E, E), wspec(E, E), wspec(E, E),  # Wq Wk Wv Wo
            wspec(E, F), wspec(F, E),                            # W1 W2
            wspec(10, Fmax),                                     # packed vectors
        ],
        out_specs=[
            rows_spec,                                          # resident hidden
            pl.BlockSpec((1, bt, L, Lpad), lambda b, l: (l, b, 0, 0)),
        ],
        out_shape=[
            jax.ShapeDtypeStruct((B * L, E), jnp.float32),
            jax.ShapeDtypeStruct((nlayers, B, L, Lpad), jnp.float32),
        ],
        scratch_shapes=[pltpu.VMEM((R, E), jnp.float32)],
        compiler_params=pltpu.CompilerParams(
            dimension_semantics=("parallel", "arbitrary"),
            vmem_limit_bytes=_vmem_limit_bytes()),
    )(x2d, bias, enc['wq'], enc['wk'], enc['wv'], enc['wo'],
      enc['w1'], enc['w2'], enc['vecs'])

    hidden = hidden2d.reshape(B, L, E)
    attns = attn_pad[..., :L]
    return hidden, attns


# ----------------------------------------------------------------------------
# Vocab head: tiled hidden2token + online log-sum-exp, fused rating MLP,
# log-softmax folded in-kernel (resident output block).
# ----------------------------------------------------------------------------
def heads_kernel(rows_ref, w_ref, b_ref, x0_ref, mw1_ref, mb1_ref, mw2_ref,
                 mb2_ref, out_ref, rating_ref, lse_ref, m_sc, l_sc, *, vt, fold):
    """One vocab tile.

    rows_ref  : (N, E)  rows needing a vocab distribution (resident)
    w_ref     : (E, vt) current vocab tile of hidden2token weight (bf16)
    b_ref     : (1, vt) bias tile (padded columns = -1e30)
    out_ref   : fold=True  -> (N, Vpad) resident block; log-probs on exit
                fold=False -> (N, vt)   per-tile raw logits (shift done outside)
    lse_ref   : (N, 1)  log-sum-exp per row (written on the last tile)
    rating_ref: (B, 1)  MLP recommender output (written on the first tile)
    """
    j = pl.program_id(0)

    @pl.when(j == 0)
    def _():
        m_sc[...] = jnp.full_like(m_sc, -jnp.inf)
        l_sc[...] = jnp.zeros_like(l_sc)
        # Tiny rating MLP, fused here to avoid a dedicated pallas_call launch.
        hmid = jax.nn.sigmoid(
            jnp.dot(x0_ref[...], mw1_ref[...],
                    preferred_element_type=jnp.float32) + mb1_ref[...])
        rating_ref[...] = (jnp.sum(hmid * mw2_ref[...], axis=-1, keepdims=True)
                           + mb2_ref[...])

    logits = (jnp.dot(rows_ref[...].astype(w_ref.dtype), w_ref[...],
                      preferred_element_type=jnp.float32) + b_ref[...])

    if fold:
        col = pl.multiple_of(j * vt, vt)
        out_ref[:, pl.ds(col, vt)] = logits
    else:
        out_ref[...] = logits

    # online log-sum-exp accumulation
    m_prev = m_sc[...]
    m_new = jnp.maximum(m_prev, jnp.max(logits, axis=-1, keepdims=True))
    l_sc[...] = (l_sc[...] * jnp.exp(m_prev - m_new)
                 + jnp.sum(jnp.exp(logits - m_new), axis=-1, keepdims=True))
    m_sc[...] = m_new

    @pl.when(j == pl.num_programs(0) - 1)
    def _():
        lse = m_sc[...] + jnp.log(l_sc[...])
        lse_ref[...] = lse
        if fold:
            out_ref[...] = out_ref[...] - lse     # finish log-softmax in place


def vocab_heads(rows, x0, h2t_w, h2t_b, mw1, mb1, mw2, mb2, *, ntoken):
    """rows: (N, E); x0: (B, E). Returns (log_probs (N, V), rating (B,))."""
    N, E = rows.shape
    B = x0.shape[0]
    V = ntoken
    vt, Vpad = _vocab_pad(V)
    if h2t_w.shape[1] != Vpad:          # defensive: prefer pre-padding at init
        pad = Vpad - h2t_w.shape[1]
        h2t_w = jnp.pad(h2t_w, ((0, 0), (0, pad)))
        h2t_b = jnp.pad(h2t_b, ((0, 0), (0, pad)), constant_values=-1e30)
    nv = Vpad // vt

    # Fold the log-softmax shift in-kernel when the resident (N, Vpad) block is
    # small; otherwise fall back to tiled logits + outside shift.
    fold = (N * Vpad * 4) <= (8 * 1024 * 1024)
    out_spec = (pl.BlockSpec((N, Vpad), lambda j: (0, 0)) if fold
                else pl.BlockSpec((N, vt), lambda j: (0, j)))

    kern = functools.partial(heads_kernel, vt=vt, fold=fold)
    out, rating, lse = pl.pallas_call(
        kern,
        grid=(nv,),
        in_specs=[
            pl.BlockSpec((N, E), lambda j: (0, 0)),     # rows (resident)
            pl.BlockSpec((E, vt), lambda j: (0, j)),    # hidden2token W tile
            pl.BlockSpec((1, vt), lambda j: (0, j)),    # hidden2token b tile
            pl.BlockSpec((B, E), lambda j: (0, 0)),     # hidden[:, 0, :]
            pl.BlockSpec((E, E), lambda j: (0, 0)),     # MLP linear1 W
            pl.BlockSpec((1, E), lambda j: (0, 0)),     # MLP linear1 b
            pl.BlockSpec((1, E), lambda j: (0, 0)),     # MLP linear2 W
            pl.BlockSpec((1, 1), lambda j: (0, 0)),     # MLP linear2 b
        ],
        out_specs=[
            out_spec,
            pl.BlockSpec((B, 1), lambda j: (0, 0)),
            pl.BlockSpec((N, 1), lambda j: (0, 0)),
        ],
        out_shape=[
            jax.ShapeDtypeStruct((N, Vpad), jnp.float32),
            jax.ShapeDtypeStruct((B, 1), jnp.float32),
            jax.ShapeDtypeStruct((N, 1), jnp.float32),
        ],
        scratch_shapes=[pltpu.VMEM((N, 1), jnp.float32),
                        pltpu.VMEM((N, 1), jnp.float32)],
        compiler_params=pltpu.CompilerParams(
            dimension_semantics=("arbitrary",),
            vmem_limit_bytes=_vmem_limit_bytes()),
    )(rows, h2t_w, h2t_b, x0, mw1, mb1, mw2, mb2)

    log_probs = out[:, :V] if fold else (out - lse)[:, :V]
    return log_probs, jnp.squeeze(rating, axis=-1)


# ----------------------------------------------------------------------------
# Parameter / mask construction (glue)
# ----------------------------------------------------------------------------
def generate_peter_mask(src_len, tgt_len):
    n = src_len + tgt_len
    mask = jnp.triu(jnp.ones((n, n), dtype=bool), k=1)   # True == masked
    mask = mask.at[0, 1].set(False)
    return mask


def init_params(key, nuser, nitem, ntoken, emsize, nhid, nlayers, nhead,
                max_len=512, weight_dtype=WEIGHT_DTYPE):
    initrange = 0.1
    keys = jax.random.split(key, 6 + nlayers)

    def uni(k, shape, r=initrange):
        return jax.random.uniform(k, shape, jnp.float32, -r, r)

    # hidden2token: padded once to the vocab-tile multiple (pad bias = -1e30
    # so padded columns never contribute to the log-sum-exp).
    _, Vpad = _vocab_pad(ntoken)
    h2t_w = uni(keys[3], (ntoken, emsize)).T                         # (E, V)
    h2t_w = jnp.pad(h2t_w, ((0, 0), (0, Vpad - ntoken))).astype(weight_dtype)
    h2t_b = jnp.full((1, Vpad), -1e30, jnp.float32).at[:, :ntoken].set(0.0)

    params = {
        'user_emb': uni(keys[0], (nuser, emsize)),
        'item_emb': uni(keys[1], (nitem, emsize)),
        'word_emb': uni(keys[2], (ntoken, emsize)),
        'h2t_w': h2t_w,
        'h2t_b': h2t_b,
        'mlp_w1': uni(keys[4], (emsize, emsize)).T,                  # (E, E)
        'mlp_b1': jnp.zeros((1, emsize), jnp.float32),
        'mlp_w2': uni(keys[5], (1, emsize)),                         # (1, E)
        'mlp_b2': jnp.zeros((1, 1), jnp.float32),
    }

    # sinusoidal positional encoding table (max_len, E)
    pos = jnp.arange(max_len, dtype=jnp.float32)[:, None]
    div = jnp.exp(jnp.arange(0, emsize, 2, dtype=jnp.float32)
                  * (-math.log(10000.0) / emsize))
    pe = jnp.zeros((max_len, emsize), jnp.float32)
    pe = pe.at[:, 0::2].set(jnp.sin(pos * div))
    pe = pe.at[:, 1::2].set(jnp.cos(pos * div))
    params['pe'] = pe

    s = 1.0 / math.sqrt(emsize)
    wq, wk, wv, wo, w1, w2 = ([] for _ in range(6))
    for l in range(nlayers):
        lk = jax.random.split(keys[6 + l], 6)
        wq.append(uni(lk[0], (emsize, emsize), s).T)
        wk.append(uni(lk[1], (emsize, emsize), s).T)
        wv.append(uni(lk[2], (emsize, emsize), s).T)
        wo.append(uni(lk[3], (emsize, emsize), s).T)
        w1.append(uni(lk[4], (nhid, emsize), s).T)                       # (E, F)
        w2.append(uni(lk[5], (emsize, nhid), 1.0 / math.sqrt(nhid)).T)   # (F, E)

    # Packed per-layer vector slab: rows = [bq,bk,bv,bo,b1,b2,g1,be1,g2,be2].
    # Biases are zero at init; LayerNorm gammas (rows 6 and 8) are one.
    Fmax = max(emsize, nhid)
    vecs = jnp.zeros((nlayers, 10, Fmax), jnp.float32)
    vecs = vecs.at[:, 6, :emsize].set(1.0)
    vecs = vecs.at[:, 8, :emsize].set(1.0)

    params['enc'] = {
        'wq': jnp.stack(wq).astype(weight_dtype),
        'wk': jnp.stack(wk).astype(weight_dtype),
        'wv': jnp.stack(wv).astype(weight_dtype),
        'wo': jnp.stack(wo).astype(weight_dtype),
        'w1': jnp.stack(w1).astype(weight_dtype),
        'w2': jnp.stack(w2).astype(weight_dtype),
        'vecs': vecs,
    }
    return params


# ----------------------------------------------------------------------------
# PETER forward
# ----------------------------------------------------------------------------
def peter_forward(params, attn_mask_full, user, item, text, *,
                  src_len, pad_idx, nhead):
    B = user.shape[0]
    text_len = text.shape[0]
    total_len = 2 + text_len
    V, E = params['word_emb'].shape

    # --- embeddings / positional encoding (glue gathers, plain XLA) ---------
    u_src = params['user_emb'][user]                    # (B, E)
    i_src = params['item_emb'][item]                    # (B, E)
    w_src = params['word_emb'][text]                    # (text_len, B, E)
    src = jnp.concatenate([u_src[None], i_src[None], w_src], axis=0)  # (L, B, E)
    src = src * math.sqrt(E) + params['pe'][:total_len, None, :]
    x = jnp.transpose(src, (1, 0, 2))                   # (B, L, E)

    # --- masks -> additive bias (B, L, L) ------------------------------------
    attn_mask = attn_mask_full[:total_len, :total_len]  # bool, True == masked
    left = jnp.zeros((B, 2), dtype=bool)
    right = (text.T == pad_idx)
    key_padding = jnp.concatenate([left, right], axis=1)
    combined = attn_mask[None, :, :] | key_padding[:, None, :]
    # -1e30 (not -inf) keeps fully-masked rows finite (PyTorch would NaN;
    # such rows are unreachable with the PETER mask).
    bias = jnp.where(combined, jnp.float32(-1e30), jnp.float32(0.0))

    # --- fused transformer encoder stack (single pallas_call) ----------------
    hidden, attns = fused_encoder(x, bias, params['enc'], nhead)

    # --- heads: one vocab-tiled call covering context + seq rows + rating ----
    tgt = total_len - src_len
    rows = jnp.concatenate([hidden[:, 1:2, :], hidden[:, src_len:, :]], axis=1)
    rows2d = rows.reshape(B * (1 + tgt), E)
    log_probs, rating = vocab_heads(
        rows2d, hidden[:, 0, :], params['h2t_w'], params['h2t_b'],
        params['mlp_w1'], params['mlp_b1'], params['mlp_w2'], params['mlp_b2'],
        ntoken=V)
    log_probs = log_probs.reshape(B, 1 + tgt, V)
    log_context_dis = log_probs[:, 0, :]                            # (B, V)
    log_word_prob = jnp.transpose(log_probs[:, 1:, :], (1, 0, 2))   # (tgt, B, V)

    return log_word_prob, log_context_dis, rating, attns


# ----------------------------------------------------------------------------
if __name__ == "__main__":
    B = 2
    emsize = 32
    nhead = 2
    nhid = 64
    nlayers = 2
    ntoken = 64
    nuser, nitem = 10, 12
    src_len, tgt_len = 3, 5
    pad_idx = 0
    total_len = src_len + tgt_len
    text_len = total_len - 2

    key = jax.random.PRNGKey(0)
    k_u, k_i, k_t, k_p = jax.random.split(key, 4)

    params = init_params(k_p, nuser, nitem, ntoken, emsize, nhid, nlayers, nhead)
    attn_mask_full = generate_peter_mask(src_len, tgt_len)

    user = jax.random.randint(k_u, (B,), 0, nuser)
    item = jax.random.randint(k_i, (B,), 0, nitem)
    text = jax.random.randint(k_t, (text_len, B), 1, ntoken)
    text = text.at[-2:, 1].set(pad_idx)   # exercise key-padding mask

    fwd = jax.jit(functools.partial(
        peter_forward, src_len=src_len, pad_idx=pad_idx, nhead=nhead))
    outs = fwd(params, attn_mask_full, user, item, text)
    log_word_prob, log_context_dis, rating, attns = jax.block_until_ready(outs)

    assert log_word_prob.shape == (tgt_len, B, ntoken)
    assert log_context_dis.shape == (B, ntoken)
    assert rating.shape == (B,)
    assert attns.shape == (nlayers, B, total_len, total_len)
    assert bool(jnp.all(jnp.isfinite(log_word_prob)))
    assert bool(jnp.all(jnp.isfinite(log_context_dis)))
    assert bool(jnp.all(jnp.isfinite(rating)))
    # log-softmax sanity: rows sum to ~1 in probability space
    assert bool(jnp.allclose(jnp.sum(jnp.exp(log_context_dis), axis=-1),
                             1.0, atol=1e-3))
    print("KERNEL_OK")
</pallas_src>

<mosaic_0001>
module attributes {stable_mosaic.version = 11 : i64} {
  func.func @heads_kernel(%arg0: i32, %arg1: memref<12x32xf32, #tpu.memory_space<vmem>>, %arg2: memref<32x128xbf16, #tpu.memory_space<vmem>>, %arg3: memref<1x128xf32, #tpu.memory_space<vmem>>, %arg4: memref<2x32xf32, #tpu.memory_space<vmem>>, %arg5: memref<32x32xf32, #tpu.memory_space<vmem>>, %arg6: memref<1x32xf32, #tpu.memory_space<vmem>>, %arg7: memref<1x32xf32, #tpu.memory_space<vmem>>, %arg8: memref<1x1xf32, #tpu.memory_space<vmem>>, %arg9: memref<12x128xf32, #tpu.memory_space<vmem>>, %arg10: memref<2x1xf32, #tpu.memory_space<vmem>>, %arg11: memref<12x1xf32, #tpu.memory_space<vmem>>, %arg12: memref<12x1xf32, #tpu.memory_space<vmem>>, %arg13: memref<12x1xf32, #tpu.memory_space<vmem>>) attributes {dimension_semantics = [#tpu.dimension_semantics<arbitrary>], iteration_bounds = array<i64: 1>, scalar_prefetch = 0 : i64, scratch_operands = 2 : i64, tpu.core_type = #tpu.core_type<tc>, window_params = [{pipeline_mode = #tpu.pipeline_mode<synchronous>, transform_indices = @transform_0, window_bounds = array<i64: 12, 32>}, {transform_indices = @transform_1, window_bounds = array<i64: 32, 128>}, {transform_indices = @transform_2, window_bounds = array<i64: 1, 128>}, {pipeline_mode = #tpu.pipeline_mode<synchronous>, transform_indices = @transform_3, window_bounds = array<i64: 2, 32>}, {pipeline_mode = #tpu.pipeline_mode<synchronous>, transform_indices = @transform_4, window_bounds = array<i64: 32, 32>}, {pipeline_mode = #tpu.pipeline_mode<synchronous>, transform_indices = @transform_5, window_bounds = array<i64: 1, 32>}, {pipeline_mode = #tpu.pipeline_mode<synchronous>, transform_indices = @transform_6, window_bounds = array<i64: 1, 32>}, {pipeline_mode = #tpu.pipeline_mode<synchronous>, transform_indices = @transform_7, window_bounds = array<i64: 1, 1>}, {pipeline_mode = #tpu.pipeline_mode<synchronous>, transform_indices = @transform_8, window_bounds = array<i64: 12, 128>}, {pipeline_mode = #tpu.pipeline_mode<synchronous>, transform_indices = @transform_9, window_bounds = array<i64: 2, 1>}, {pipeline_mode = #tpu.pipeline_mode<synchronous>, transform_indices = @transform_10, window_bounds = array<i64: 12, 1>}]} {
    %c0_i32 = arith.constant 0 : i32
    %0 = arith.cmpi eq, %arg0, %c0_i32 : i32
    %1 = arith.extui %0 : i1 to i32
    %c0_i32_0 = arith.constant 0 : i32
    %2 = arith.cmpi ne, %1, %c0_i32_0 : i32
    scf.if %2 {
      %cst_19 = arith.constant 0xFF800000 : f32
      %33 = vector.broadcast %cst_19 : f32 to vector<12x1xf32>
      %c0_20 = arith.constant 0 : index
      %c0_21 = arith.constant 0 : index
      %34 = vector.load %arg12[%c0_20, %c0_21] : memref<12x1xf32, #tpu.memory_space<vmem>>, vector<12x1xf32>
      tpu.vector_store %arg12[%c0_20, %c0_21], %33 {strides = array<i32>} : memref<12x1xf32, #tpu.memory_space<vmem>>, vector<12x1xf32>,
      %cst_22 = arith.constant 0.000000e+00 : f32
      %35 = vector.broadcast %cst_22 : f32 to vector<12x1xf32>
      %c0_23 = arith.constant 0 : index
      %c0_24 = arith.constant 0 : index
      %36 = vector.load %arg13[%c0_23, %c0_24] : memref<12x1xf32, #tpu.memory_space<vmem>>, vector<12x1xf32>
      tpu.vector_store %arg13[%c0_23, %c0_24], %35 {strides = array<i32>} : memref<12x1xf32, #tpu.memory_space<vmem>>, vector<12x1xf32>,
      %c0_25 = arith.constant 0 : index
      %c0_26 = arith.constant 0 : index
      %37 = vector.load %arg4[%c0_25, %c0_26] : memref<2x32xf32, #tpu.memory_space<vmem>>, vector<2x32xf32>
      %c0_27 = arith.constant 0 : index
      %c0_28 = arith.constant 0 : index
      %38 = vector.load %arg5[%c0_27, %c0_28] : memref<32x32xf32, #tpu.memory_space<vmem>>, vector<32x32xf32>
      %cst_29 = arith.constant dense<0.000000e+00> : vector<2x32xf32>
      %39 = tpu.matmul %37, %38, %cst_29 {dimension_numbers = #tpu.dot_dimension_numbers<[1], [0], [0], [1], [0, 0, 1, 1], [], []>} : vector<2x32xf32>, vector<32x32xf32>, vector<2x32xf32> -> vector<2x32xf32>
      %c0_30 = arith.constant 0 : index
      %c0_31 = arith.constant 0 : index
      %40 = vector.load %arg6[%c0_30, %c0_31] : memref<1x32xf32, #tpu.memory_space<vmem>>, vector<1x32xf32>
      %41 = vector.broadcast %40 : vector<1x32xf32> to vector<2x32xf32>
      %42 = arith.addf %39, %41 : vector<2x32xf32>
      %43 = arith.negf %42 : vector<2x32xf32>
      %44 = math.exp %43 : vector<2x32xf32>
      %cst_32 = arith.constant 1.000000e+00 : f32
      %45 = vector.broadcast %cst_32 : f32 to vector<2x32xf32>
      %46 = arith.addf %45, %44 : vector<2x32xf32>
      %47 = arith.divf %45, %46 : vector<2x32xf32>
      %c0_33 = arith.constant 0 : index
      %c0_34 = arith.constant 0 : index
      %48 = vector.load %arg7[%c0_33, %c0_34] : memref<1x32xf32, #tpu.memory_space<vmem>>, vector<1x32xf32>
      %49 = vector.broadcast %48 : vector<1x32xf32> to vector<2x32xf32>
      %50 = arith.mulf %47, %49 : vector<2x32xf32>
      %cst_35 = arith.constant dense<0.000000e+00> : vector<2xf32>
      %51 = vector.multi_reduction <add>, %50, %cst_35 [1] : vector<2x32xf32> to vector<2xf32>
      %52 = vector.shape_cast %51 : vector<2xf32> to vector<2x1xf32>
      %c0_36 = arith.constant 0 : index
      %c0_37 = arith.constant 0 : index
      %53 = vector.load %arg8[%c0_36, %c0_37] : memref<1x1xf32, #tpu.memory_space<vmem>>, vector<1x1xf32>
      %54 = vector.broadcast %53 : vector<1x1xf32> to vector<2x1xf32>
      %55 = arith.addf %52, %54 : vector<2x1xf32>
      %c0_38 = arith.constant 0 : index
      %c0_39 = arith.constant 0 : index
      %56 = vector.load %arg10[%c0_38, %c0_39] : memref<2x1xf32, #tpu.memory_space<vmem>>, vector<2x1xf32>
      tpu.vector_store %arg10[%c0_38, %c0_39], %55 {strides = array<i32>} : memref<2x1xf32, #tpu.memory_space<vmem>>, vector<2x1xf32>,
    } else {
    }
    %c0 = arith.constant 0 : index
    %c0_1 = arith.constant 0 : index
    %3 = vector.load %arg1[%c0, %c0_1] : memref<12x32xf32, #tpu.memory_space<vmem>>, vector<12x32xf32>
    %4 = arith.truncf %3 : vector<12x32xf32> to vector<12x32xbf16>
    %c0_2 = arith.constant 0 : index
    %c0_3 = arith.constant 0 : index
    %5 = vector.load %arg2[%c0_2, %c0_3] : memref<32x128xbf16, #tpu.memory_space<vmem>>, vector<32x128xbf16>
    %cst = arith.constant dense<0.000000e+00> : vector<12x128xf32>
    %6 = tpu.matmul %4, %5, %cst {dimension_numbers = #tpu.dot_dimension_numbers<[1], [0], [0], [1], [0, 0, 1, 1], [], []>} : vector<12x32xbf16>, vector<32x128xbf16>, vector<12x128xf32> -> vector<12x128xf32>
    %c0_4 = arith.constant 0 : index
    %c0_5 = arith.constant 0 : index
    %7 = vector.load %arg3[%c0_4, %c0_5] : memref<1x128xf32, #tpu.memory_space<vmem>>, vector<1x128xf32>
    %8 = vector.broadcast %7 : vector<1x128xf32> to vector<12x128xf32>
    %9 = arith.addf %6, %8 : vector<12x128xf32>
    %c128_i32 = arith.constant 128 : i32
    %10 = arith.muli %arg0, %c128_i32 : i32
    %11 = tpu.assume_multiple %10, 128 : i32
    %c0_6 = arith.constant 0 : index
    %12 = arith.index_cast %11 : i32 to index
    %13 = vector.load %arg9[%c0_6, %12] : memref<12x128xf32, #tpu.memory_space<vmem>>, vector<12x128xf32>
    tpu.vector_store %arg9[%c0_6, %12], %9 {strides = array<i32>} : memref<12x128xf32, #tpu.memory_space<vmem>>, vector<12x128xf32>,
    %c0_7 = arith.constant 0 : index
    %c0_8 = arith.constant 0 : index
    %14 = vector.load %arg12[%c0_7, %c0_8] : memref<12x1xf32, #tpu.memory_space<vmem>>, vector<12x1xf32>
    %cst_9 = arith.constant dense<0xFF800000> : vector<12xf32>
    %15 = vector.multi_reduction <maximumf>, %9, %cst_9 [1] : vector<12x128xf32> to vector<12xf32>
    %16 = vector.shape_cast %15 : vector<12xf32> to vector<12x1xf32>
    %17 = arith.maximumf %14, %16 : vector<12x1xf32>
    %c0_10 = arith.constant 0 : index
    %c0_11 = arith.constant 0 : index
    %18 = vector.load %arg13[%c0_10, %c0_11] : memref<12x1xf32, #tpu.memory_space<vmem>>, vector<12x1xf32>
    %19 = arith.subf %14, %17 : vector<12x1xf32>
    %20 = math.exp %19 : vector<12x1xf32>
    %21 = arith.mulf %18, %20 : vector<12x1xf32>
    %22 = vector.broadcast %17 : vector<12x1xf32> to vector<12x128xf32>
    %23 = arith.subf %9, %22 : vector<12x128xf32>
    %24 = math.exp %23 : vector<12x128xf32>
    %cst_12 = arith.constant dense<0.000000e+00> : vector<12xf32>
    %25 = vector.multi_reduction <add>, %24, %cst_12 [1] : vector<12x128xf32> to vector<12xf32>
    %26 = vector.shape_cast %25 : vector<12xf32> to vector<12x1xf32>
    %27 = arith.addf %21, %26 : vector<12x1xf32>
    %c0_13 = arith.constant 0 : index
    %c0_14 = arith.constant 0 : index
    %28 = vector.load %arg13[%c0_13, %c0_14] : memref<12x1xf32, #tpu.memory_space<vmem>>, vector<12x1xf32>
    tpu.vector_store %arg13[%c0_13, %c0_14], %27 {strides = array<i32>} : memref<12x1xf32, #tpu.memory_space<vmem>>, vector<12x1xf32>,
    %c0_15 = arith.constant 0 : index
    %c0_16 = arith.constant 0 : index
    %29 = vector.load %arg12[%c0_15, %c0_16] : memref<12x1xf32, #tpu.memory_space<vmem>>, vector<12x1xf32>
    tpu.vector_store %arg12[%c0_15, %c0_16], %17 {strides = array<i32>} : memref<12x1xf32, #tpu.memory_space<vmem>>, vector<12x1xf32>,
    %c0_i32_17 = arith.constant 0 : i32
    %30 = arith.cmpi eq, %arg0, %c0_i32_17 : i32
    %31 = arith.extui %30 : i1 to i32
    %c0_i32_18 = arith.constant 0 : i32
    %32 = arith.cmpi ne, %31, %c0_i32_18 : i32
    scf.if %32 {
      %c0_19 = arith.constant 0 : index
      %c0_20 = arith.constant 0 : index
      %33 = vector.load %arg12[%c0_19, %c0_20] : memref<12x1xf32, #tpu.memory_space<vmem>>, vector<12x1xf32>
      %c0_21 = arith.constant 0 : index
      %c0_22 = arith.constant 0 : index
      %34 = vector.load %arg13[%c0_21, %c0_22] : memref<12x1xf32, #tpu.memory_space<vmem>>, vector<12x1xf32>
      %35 = math.log %34 : vector<12x1xf32>
      %36 = arith.addf %33, %35 : vector<12x1xf32>
      %c0_23 = arith.constant 0 : index
      %c0_24 = arith.constant 0 : index
      %37 = vector.load %arg11[%c0_23, %c0_24] : memref<12x1xf32, #tpu.memory_space<vmem>>, vector<12x1xf32>
      tpu.vector_store %arg11[%c0_23, %c0_24], %36 {strides = array<i32>} : memref<12x1xf32, #tpu.memory_space<vmem>>, vector<12x1xf32>,
      %c0_25 = arith.constant 0 : index
      %c0_26 = arith.constant 0 : index
      %38 = vector.load %arg9[%c0_25, %c0_26] : memref<12x128xf32, #tpu.memory_space<vmem>>, vector<12x128xf32>
      %39 = vector.broadcast %36 : vector<12x1xf32> to vector<12x128xf32>
      %40 = arith.subf %38, %39 : vector<12x128xf32>
      %c0_27 = arith.constant 0 : index
      %c0_28 = arith.constant 0 : index
      %41 = vector.load %arg9[%c0_27, %c0_28] : memref<12x128xf32, #tpu.memory_space<vmem>>, vector<12x128xf32>
      tpu.vector_store %arg9[%c0_27, %c0_28], %40 {strides = array<i32>} : memref<12x128xf32, #tpu.memory_space<vmem>>, vector<12x128xf32>,
    } else {
    }
    return
  }
  func.func @transform_0(%arg0: i32) -> (i32, i32) {
    %c0_i32 = arith.constant 0 : i32
    %c0_i32_0 = arith.constant 0 : i32
    %c0_i32_1 = arith.constant 0 : i32
    return %c0_i32, %c0_i32_0 : i32, i32
  }
  func.func @transform_1(%arg0: i32) -> (i32, i32) {
    %c0_i32 = arith.constant 0 : i32
    %c0_i32_0 = arith.constant 0 : i32
    return %c0_i32, %arg0 : i32, i32
  }
  func.func @transform_2(%arg0: i32) -> (i32, i32) {
    %c0_i32 = arith.constant 0 : i32
    %c0_i32_0 = arith.constant 0 : i32
    return %c0_i32, %arg0 : i32, i32
  }
  func.func @transform_3(%arg0: i32) -> (i32, i32) {
    %c0_i32 = arith.constant 0 : i32
    %c0_i32_0 = arith.constant 0 : i32
    %c0_i32_1 = arith.constant 0 : i32
    return %c0_i32, %c0_i32_0 : i32, i32
  }
  func.func @transform_4(%arg0: i32) -> (i32, i32) {
    %c0_i32 = arith.constant 0 : i32
    %c0_i32_0 = arith.constant 0 : i32
    %c0_i32_1 = arith.constant 0 : i32
    return %c0_i32, %c0_i32_0 : i32, i32
  }
  func.func @transform_5(%arg0: i32) -> (i32, i32) {
    %c0_i32 = arith.constant 0 : i32
    %c0_i32_0 = arith.constant 0 : i32
    %c0_i32_1 = arith.constant 0 : i32
    return %c0_i32, %c0_i32_0 : i32, i32
  }
  func.func @transform_6(%arg0: i32) -> (i32, i32) {
    %c0_i32 = arith.constant 0 : i32
    %c0_i32_0 = arith.constant 0 : i32
    %c0_i32_1 = arith.constant 0 : i32
    return %c0_i32, %c0_i32_0 : i32, i32
  }
  func.func @transform_7(%arg0: i32) -> (i32, i32) {
    %c0_i32 = arith.constant 0 : i32
    %c0_i32_0 = arith.constant 0 : i32
    %c0_i32_1 = arith.constant 0 : i32
    return %c0_i32, %c0_i32_0 : i32, i32
  }
  func.func @transform_8(%arg0: i32) -> (i32, i32) {
    %c0_i32 = arith.constant 0 : i32
    %c0_i32_0 = arith.constant 0 : i32
    %c0_i32_1 = arith.constant 0 : i32
    return %c0_i32, %c0_i32_0 : i32, i32
  }
  func.func @transform_9(%arg0: i32) -> (i32, i32) {
    %c0_i32 = arith.constant 0 : i32
    %c0_i32_0 = arith.constant 0 : i32
    %c0_i32_1 = arith.constant 0 : i32
    return %c0_i32, %c0_i32_0 : i32, i32
  }
  func.func @transform_10(%arg0: i32) -> (i32, i32) {
    %c0_i32 = arith.constant 0 : i32
    %c0_i32_0 = arith.constant 0 : i32
    %c0_i32_1 = arith.constant 0 : i32
    return %c0_i32, %c0_i32_0 : i32, i32
  }
}

module attributes {stable_mosaic.version = 11 : i64} {
  func.func @fused_encoder_kernel(%arg0: i32, %arg1: i32, %arg2: memref<8x32xf32, #tpu.memory_space<vmem>>, %arg3: memref<1x8x8xf32, #tpu.memory_space<vmem>>, %arg4: memref<1x32x32xbf16, #tpu.memory_space<vmem>>, %arg5: memref<1x32x32xbf16, #tpu.memory_space<vmem>>, %arg6: memref<1x32x32xbf16, #tpu.memory_space<vmem>>, %arg7: memref<1x32x32xbf16, #tpu.memory_space<vmem>>, %arg8: memref<1x32x64xbf16, #tpu.memory_space<vmem>>, %arg9: memref<1x64x32xbf16, #tpu.memory_space<vmem>>, %arg10: memref<1x10x64xf32, #tpu.memory_space<vmem>>, %arg11: memref<8x32xf32, #tpu.memory_space<vmem>>, %arg12: memref<1x1x8x128xf32, #tpu.memory_space<vmem>>, %arg13: memref<8x32xf32, #tpu.memory_space<vmem>>) attributes {dimension_semantics = [#tpu.dimension_semantics<parallel>, #tpu.dimension_semantics<arbitrary>], iteration_bounds = array<i64: 2, 2>, scalar_prefetch = 0 : i64, scratch_operands = 1 : i64, tpu.core_type = #tpu.core_type<tc>, window_params = [{transform_indices = @transform_0, window_bounds = array<i64: 8, 32>}, {transform_indices = @transform_1, window_bounds = array<i64: 1, 8, 8>}, {transform_indices = @transform_2, window_bounds = array<i64: 1, 32, 32>}, {transform_indices = @transform_3, window_bounds = array<i64: 1, 32, 32>}, {transform_indices = @transform_4, window_bounds = array<i64: 1, 32, 32>}, {transform_indices = @transform_5, window_bounds = array<i64: 1, 32, 32>}, {transform_indices = @transform_6, window_bounds = array<i64: 1, 32, 64>}, {transform_indices = @transform_7, window_bounds = array<i64: 1, 64, 32>}, {transform_indices = @transform_8, window_bounds = array<i64: 1, 10, 64>}, {transform_indices = @transform_9, window_bounds = array<i64: 8, 32>}, {transform_indices = @transform_10, window_bounds = array<i64: 1, 1, 8, 128>}]} {
    %c0_i32 = arith.constant 0 : i32
    %0 = arith.cmpi eq, %arg1, %c0_i32 : i32
    %1 = arith.extui %0 : i1 to i32
    %c0_i32_0 = arith.constant 0 : i32
    %2 = arith.cmpi ne, %1, %c0_i32_0 : i32
    scf.if %2 {
      %c0_64 = arith.constant 0 : index
      %c0_65 = arith.constant 0 : index
      %148 = vector.load %arg2[%c0_64, %c0_65] : memref<8x32xf32, #tpu.memory_space<vmem>>, vector<8x32xf32>
      %c0_66 = arith.constant 0 : index
      %c0_67 = arith.constant 0 : index
      %149 = vector.load %arg11[%c0_66, %c0_67] : memref<8x32xf32, #tpu.memory_space<vmem>>, vector<8x32xf32>
      tpu.vector_store %arg11[%c0_66, %c0_67], %148 {strides = array<i32>} : memref<8x32xf32, #tpu.memory_space<vmem>>, vector<8x32xf32>,
    } else {
    }
    %c0 = arith.constant 0 : index
    %c0_1 = arith.constant 0 : index
    %3 = vector.load %arg11[%c0, %c0_1] : memref<8x32xf32, #tpu.memory_space<vmem>>, vector<8x32xf32>
    %c0_2 = arith.constant 0 : index
    %c0_3 = arith.constant 0 : index
    %c0_4 = arith.constant 0 : index
    %4 = vector.load %arg10[%c0_2, %c0_3, %c0_4] : memref<1x10x64xf32, #tpu.memory_space<vmem>>, vector<1x10x64xf32>
    %5 = vector.shape_cast %4 : vector<1x10x64xf32> to vector<10x64xf32>
    %6 = vector.extract_strided_slice %5 {offsets = [0, 0], sizes = [1, 32], strides = [1, 1]} : vector<10x64xf32> to vector<1x32xf32>
    %7 = vector.extract_strided_slice %5 {offsets = [1, 0], sizes = [1, 32], strides = [1, 1]} : vector<10x64xf32> to vector<1x32xf32>
    %8 = vector.extract_strided_slice %5 {offsets = [2, 0], sizes = [1, 32], strides = [1, 1]} : vector<10x64xf32> to vector<1x32xf32>
    %9 = vector.extract_strided_slice %5 {offsets = [3, 0], sizes = [1, 32], strides = [1, 1]} : vector<10x64xf32> to vector<1x32xf32>
    %10 = vector.extract_strided_slice %5 {offsets = [4, 0], sizes = [1, 64], strides = [1, 1]} : vector<10x64xf32> to vector<1x64xf32>
    %11 = vector.extract_strided_slice %5 {offsets = [5, 0], sizes = [1, 32], strides = [1, 1]} : vector<10x64xf32> to vector<1x32xf32>
    %12 = vector.extract_strided_slice %5 {offsets = [6, 0], sizes = [1, 32], strides = [1, 1]} : vector<10x64xf32> to vector<1x32xf32>
    %13 = vector.extract_strided_slice %5 {offsets = [7, 0], sizes = [1, 32], strides = [1, 1]} : vector<10x64xf32> to vector<1x32xf32>
    %14 = vector.extract_strided_slice %5 {offsets = [8, 0], sizes = [1, 32], strides = [1, 1]} : vector<10x64xf32> to vector<1x32xf32>
    %15 = vector.extract_strided_slice %5 {offsets = [9, 0], sizes = [1, 32], strides = [1, 1]} : vector<10x64xf32> to vector<1x32xf32>
    %16 = arith.truncf %3 : vector<8x32xf32> to vector<8x32xbf16>
    %c0_5 = arith.constant 0 : index
    %c0_6 = arith.constant 0 : index
    %c0_7 = arith.constant 0 : index
    %17 = vector.load %arg4[%c0_5, %c0_6, %c0_7] : memref<1x32x32xbf16, #tpu.memory_space<vmem>>, vector<1x32x32xbf16>
    %18 = vector.shape_cast %17 : vector<1x32x32xbf16> to vector<32x32xbf16>
    %cst = arith.constant dense<0.000000e+00> : vector<8x32xf32>
    %19 = tpu.matmul %16, %18, %cst {dimension_numbers = #tpu.dot_dimension_numbers<[1], [0], [0], [1], [0, 0, 1, 1], [], []>} : vector<8x32xbf16>, vector<32x32xbf16>, vector<8x32xf32> -> vector<8x32xf32>
    %20 = vector.broadcast %6 : vector<1x32xf32> to vector<8x32xf32>
    %21 = arith.addf %19, %20 : vector<8x32xf32>
    %cst_8 = arith.constant 2.500000e-01 : f32
    %22 = vector.broadcast %cst_8 : f32 to vector<8x32xf32>
    %23 = arith.mulf %21, %22 : vector<8x32xf32>
    %c0_9 = arith.constant 0 : index
    %c0_10 = arith.constant 0 : index
    %c0_11 = arith.constant 0 : index
    %24 = vector.load %arg5[%c0_9, %c0_10, %c0_11] : memref<1x32x32xbf16, #tpu.memory_space<vmem>>, vector<1x32x32xbf16>
    %25 = vector.shape_cast %24 : vector<1x32x32xbf16> to vector<32x32xbf16>
    %cst_12 = arith.constant dense<0.000000e+00> : vector<8x32xf32>
    %26 = tpu.matmul %16, %25, %cst_12 {dimension_numbers = #tpu.dot_dimension_numbers<[1], [0], [0], [1], [0, 0, 1, 1], [], []>} : vector<8x32xbf16>, vector<32x32xbf16>, vector<8x32xf32> -> vector<8x32xf32>
    %27 = vector.broadcast %7 : vector<1x32xf32> to vector<8x32xf32>
    %28 = arith.addf %26, %27 : vector<8x32xf32>
    %c0_13 = arith.constant 0 : index
    %c0_14 = arith.constant 0 : index
    %c0_15 = arith.constant 0 : index
    %29 = vector.load %arg6[%c0_13, %c0_14, %c0_15] : memref<1x32x32xbf16, #tpu.memory_space<vmem>>, vector<1x32x32xbf16>
    %30 = vector.shape_cast %29 : vector<1x32x32xbf16> to vector<32x32xbf16>
    %cst_16 = arith.constant dense<0.000000e+00> : vector<8x32xf32>
    %31 = tpu.matmul %16, %30, %cst_16 {dimension_numbers = #tpu.dot_dimension_numbers<[1], [0], [0], [1], [0, 0, 1, 1], [], []>} : vector<8x32xbf16>, vector<32x32xbf16>, vector<8x32xf32> -> vector<8x32xf32>
    %32 = vector.broadcast %8 : vector<1x32xf32> to vector<8x32xf32>
    %33 = arith.addf %31, %32 : vector<8x32xf32>
    %34 = vector.shape_cast %23 : vector<8x32xf32> to vector<1x8x32xf32>
    %35 = vector.shape_cast %28 : vector<8x32xf32> to vector<1x8x32xf32>
    %36 = vector.shape_cast %33 : vector<8x32xf32> to vector<1x8x32xf32>
    %c0_17 = arith.constant 0 : index
    %c0_18 = arith.constant 0 : index
    %c0_19 = arith.constant 0 : index
    %37 = vector.load %arg3[%c0_17, %c0_18, %c0_19] : memref<1x8x8xf32, #tpu.memory_space<vmem>>, vector<1x8x8xf32>
    %cst_20 = arith.constant 0.000000e+00 : f32
    %38 = vector.broadcast %cst_20 : f32 to vector<1x8x8xf32>
    %39 = vector.extract_strided_slice %34 {offsets = [0, 0, 0], sizes = [1, 8, 16], strides = [1, 1, 1]} : vector<1x8x32xf32> to vector<1x8x16xf32>
    %40 = vector.extract_strided_slice %35 {offsets = [0, 0, 0], sizes = [1, 8, 16], strides = [1, 1, 1]} : vector<1x8x32xf32> to vector<1x8x16xf32>
    "tpu.trace_start"() <{level = 10 : i32, message = "bqd,bkd->bqk"}> : () -> ()
    %cst_21 = arith.constant dense<0.000000e+00> : vector<1x8x8xf32>
    %41 = tpu.matmul %39, %40, %cst_21 {dimension_numbers = #tpu.dot_dimension_numbers<[2], [2], [1], [1], [0, 0, 0, 1, 1, 1], [0], [0]>} : vector<1x8x16xf32>, vector<1x8x16xf32>, vector<1x8x8xf32> -> vector<1x8x8xf32>
    "tpu.trace_stop"() : () -> ()
    %42 = arith.addf %41, %37 : vector<1x8x8xf32>
    %cst_22 = arith.constant dense<0xFF800000> : vector<1x8xf32>
    %43 = vector.multi_reduction <maximumf>, %42, %cst_22 [2] : vector<1x8x8xf32> to vector<1x8xf32>
    %44 = vector.shape_cast %43 : vector<1x8xf32> to vector<1x8x1xf32>
    %45 = vector.broadcast %44 : vector<1x8x1xf32> to vector<1x8x8xf32>
    %46 = arith.subf %42, %45 : vector<1x8x8xf32>
    %47 = math.exp %46 : vector<1x8x8xf32>
    %cst_23 = arith.constant dense<0.000000e+00> : vector<1x8xf32>
    %48 = vector.multi_reduction <add>, %47, %cst_23 [2] : vector<1x8x8xf32> to vector<1x8xf32>
    %49 = vector.shape_cast %48 : vector<1x8xf32> to vector<1x8x1xf32>
    %50 = vector.broadcast %49 : vector<1x8x1xf32> to vector<1x8x8xf32>
    %51 = arith.divf %47, %50 : vector<1x8x8xf32>
    %52 = arith.addf %38, %51 : vector<1x8x8xf32>
    %53 = vector.extract_strided_slice %36 {offsets = [0, 0, 0], sizes = [1, 8, 16], strides = [1, 1, 1]} : vector<1x8x32xf32> to vector<1x8x16xf32>
    "tpu.trace_start"() <{level = 10 : i32, message = "bqk,bkd->bqd"}> : () -> ()
    %cst_24 = arith.constant dense<0.000000e+00> : vector<1x8x16xf32>
    %54 = tpu.matmul %51, %53, %cst_24 {dimension_numbers = #tpu.dot_dimension_numbers<[2], [1], [1], [2], [0, 0, 0, 1, 1, 2], [0], [0]>} : vector<1x8x8xf32>, vector<1x8x16xf32>, vector<1x8x16xf32> -> vector<1x8x16xf32>
    "tpu.trace_stop"() : () -> ()
    %55 = vector.shape_cast %54 : vector<1x8x16xf32> to vector<8x16xf32>
    %c0_25 = arith.constant 0 : index
    %c0_26 = arith.constant 0 : index
    %56 = vector.load %arg13[%c0_25, %c0_26] : memref<8x32xf32, #tpu.memory_space<vmem>>, vector<8x16xf32>
    tpu.vector_store %arg13[%c0_25, %c0_26], %55 {strides = array<i32>} : memref<8x32xf32, #tpu.memory_space<vmem>>, vector<8x16xf32>,
    %57 = vector.extract_strided_slice %34 {offsets = [0, 0, 16], sizes = [1, 8, 16], strides = [1, 1, 1]} : vector<1x8x32xf32> to vector<1x8x16xf32>
    %58 = vector.extract_strided_slice %35 {offsets = [0, 0, 16], sizes = [1, 8, 16], strides = [1, 1, 1]} : vector<1x8x32xf32> to vector<1x8x16xf32>
    "tpu.trace_start"() <{level = 10 : i32, message = "bqd,bkd->bqk"}> : () -> ()
    %cst_27 = arith.constant dense<0.000000e+00> : vector<1x8x8xf32>
    %59 = tpu.matmul %57, %58, %cst_27 {dimension_numbers = #tpu.dot_dimension_numbers<[2], [2], [1], [1], [0, 0, 0, 1, 1, 1], [0], [0]>} : vector<1x8x16xf32>, vector<1x8x16xf32>, vector<1x8x8xf32> -> vector<1x8x8xf32>
    "tpu.trace_stop"() : () -> ()
    %60 = arith.addf %59, %37 : vector<1x8x8xf32>
    %cst_28 = arith.constant dense<0xFF800000> : vector<1x8xf32>
    %61 = vector.multi_reduction <maximumf>, %60, %cst_28 [2] : vector<1x8x8xf32> to vector<1x8xf32>
    %62 = vector.shape_cast %61 : vector<1x8xf32> to vector<1x8x1xf32>
    %63 = vector.broadcast %62 : vector<1x8x1xf32> to vector<1x8x8xf32>
    %64 = arith.subf %60, %63 : vector<1x8x8xf32>
    %65 = math.exp %64 : vector<1x8x8xf32>
    %cst_29 = arith.constant dense<0.000000e+00> : vector<1x8xf32>
    %66 = vector.multi_reduction <add>, %65, %cst_29 [2] : vector<1x8x8xf32> to vector<1x8xf32>
    %67 = vector.shape_cast %66 : vector<1x8xf32> to vector<1x8x1xf32>
    %68 = vector.broadcast %67 : vector<1x8x1xf32> to vector<1x8x8xf32>
    %69 = arith.divf %65, %68 : vector<1x8x8xf32>
    %70 = arith.addf %52, %69 : vector<1x8x8xf32>
    %71 = vector.extract_strided_slice %36 {offsets = [0, 0, 16], sizes = [1, 8, 16], strides = [1, 1, 1]} : vector<1x8x32xf32> to vector<1x8x16xf32>
    "tpu.trace_start"() <{level = 10 : i32, message = "bqk,bkd->bqd"}> : () -> ()
    %cst_30 = arith.constant dense<0.000000e+00> : vector<1x8x16xf32>
    %72 = tpu.matmul %69, %71, %cst_30 {dimension_numbers = #tpu.dot_dimension_numbers<[2], [1], [1], [2], [0, 0, 0, 1, 1, 2], [0], [0]>} : vector<1x8x8xf32>, vector<1x8x16xf32>, vector<1x8x16xf32> -> vector<1x8x16xf32>
    "tpu.trace_stop"() : () -> ()
    %73 = vector.shape_cast %72 : vector<1x8x16xf32> to vector<8x16xf32>
    %c0_31 = arith.constant 0 : index
    %c16 = arith.constant 16 : index
    %74 = vector.load %arg13[%c0_31, %c16] : memref<8x32xf32, #tpu.memory_space<vmem>>, vector<8x16xf32>
    tpu.vector_store %arg13[%c0_31, %c16], %73 {strides = array<i32>} : memref<8x32xf32, #tpu.memory_space<vmem>>, vector<8x16xf32>,
    %cst_32 = arith.constant 5.000000e-01 : f32
    %75 = vector.broadcast %cst_32 : f32 to vector<1x8x8xf32>
    %76 = arith.mulf %70, %75 : vector<1x8x8xf32>
    %c0_33 = arith.constant 0 : index
    %c0_34 = arith.constant 0 : index
    %c0_35 = arith.constant 0 : index
    %c0_36 = arith.constant 0 : index
    %77 = vector.load %arg12[%c0_33, %c0_34, %c0_35, %c0_36] : memref<1x1x8x128xf32, #tpu.memory_space<vmem>>, vector<1x1x8x8xf32>
    %78 = vector.shape_cast %77 : vector<1x1x8x8xf32> to vector<1x8x8xf32>
    %79 = vector.shape_cast %76 : vector<1x8x8xf32> to vector<1x1x8x8xf32>
    tpu.vector_store %arg12[%c0_33, %c0_34, %c0_35, %c0_36], %79 {strides = array<i32>} : memref<1x1x8x128xf32, #tpu.memory_space<vmem>>, vector<1x1x8x8xf32>,
    %c0_37 = arith.constant 0 : index
    %c0_38 = arith.constant 0 : index
    %80 = vector.load %arg13[%c0_37, %c0_38] : memref<8x32xf32, #tpu.memory_space<vmem>>, vector<8x32xf32>
    %81 = arith.truncf %80 : vector<8x32xf32> to vector<8x32xbf16>
    %c0_39 = arith.constant 0 : index
    %c0_40 = arith.constant 0 : index
    %c0_41 = arith.constant 0 : index
    %82 = vector.load %arg7[%c0_39, %c0_40, %c0_41] : memref<1x32x32xbf16, #tpu.memory_space<vmem>>, vector<1x32x32xbf16>
    %83 = vector.shape_cast %82 : vector<1x32x32xbf16> to vector<32x32xbf16>
    %cst_42 = arith.constant dense<0.000000e+00> : vector<8x32xf32>
    %84 = tpu.matmul %81, %83, %cst_42 {dimension_numbers = #tpu.dot_dimension_numbers<[1], [0], [0], [1], [0, 0, 1, 1], [], []>} : vector<8x32xbf16>, vector<32x32xbf16>, vector<8x32xf32> -> vector<8x32xf32>
    %85 = vector.broadcast %9 : vector<1x32xf32> to vector<8x32xf32>
    %86 = arith.addf %84, %85 : vector<8x32xf32>
    %87 = arith.addf %3, %86 : vector<8x32xf32>
    %cst_43 = arith.constant dense<0.000000e+00> : vector<8xf32>
    %88 = vector.multi_reduction <add>, %87, %cst_43 [1] : vector<8x32xf32> to vector<8xf32>
    %89 = vector.shape_cast %88 : vector<8xf32> to vector<8x1xf32>
    %cst_44 = arith.constant 3.200000e+01 : f32
    %90 = vector.broadcast %cst_44 : f32 to vector<8x1xf32>
    %91 = arith.divf %89, %90 : vector<8x1xf32>
    %92 = vector.broadcast %91 : vector<8x1xf32> to vector<8x32xf32>
    %93 = arith.subf %87, %92 : vector<8x32xf32>
    %94 = arith.mulf %93, %93 : vector<8x32xf32>
    %cst_45 = arith.constant dense<0.000000e+00> : vector<8xf32>
    %95 = vector.multi_reduction <add>, %94, %cst_45 [1] : vector<8x32xf32> to vector<8xf32>
    %96 = vector.shape_cast %95 : vector<8xf32> to vector<8x1xf32>
    %cst_46 = arith.constant 3.200000e+01 : f32
    %97 = vector.broadcast %cst_46 : f32 to vector<8x1xf32>
    %98 = arith.divf %96, %97 : vector<8x1xf32>
    %99 = vector.broadcast %91 : vector<8x1xf32> to vector<8x32xf32>
    %100 = arith.subf %87, %99 : vector<8x32xf32>
    %cst_47 = arith.constant 9.99999974E-6 : f32
    %101 = vector.broadcast %cst_47 : f32 to vector<8x1xf32>
    %102 = arith.addf %98, %101 : vector<8x1xf32>
    %103 = math.rsqrt %102 : vector<8x1xf32>
    %104 = vector.broadcast %103 : vector<8x1xf32> to vector<8x32xf32>
    %105 = arith.mulf %100, %104 : vector<8x32xf32>
    %106 = vector.broadcast %12 : vector<1x32xf32> to vector<8x32xf32>
    %107 = arith.mulf %105, %106 : vector<8x32xf32>
    %108 = vector.broadcast %13 : vector<1x32xf32> to vector<8x32xf32>
    %109 = arith.addf %107, %108 : vector<8x32xf32>
    %110 = arith.truncf %109 : vector<8x32xf32> to vector<8x32xbf16>
    %c0_48 = arith.constant 0 : index
    %c0_49 = arith.constant 0 : index
    %c0_50 = arith.constant 0 : index
    %111 = vector.load %arg8[%c0_48, %c0_49, %c0_50] : memref<1x32x64xbf16, #tpu.memory_space<vmem>>, vector<1x32x64xbf16>
    %112 = vector.shape_cast %111 : vector<1x32x64xbf16> to vector<32x64xbf16>
    %cst_51 = arith.constant dense<0.000000e+00> : vector<8x64xf32>
    %113 = tpu.matmul %110, %112, %cst_51 {dimension_numbers = #tpu.dot_dimension_numbers<[1], [0], [0], [1], [0, 0, 1, 1], [], []>} : vector<8x32xbf16>, vector<32x64xbf16>, vector<8x64xf32> -> vector<8x64xf32>
    %114 = vector.broadcast %10 : vector<1x64xf32> to vector<8x64xf32>
    %115 = arith.addf %113, %114 : vector<8x64xf32>
    %cst_52 = arith.constant 0.000000e+00 : f32
    %116 = vector.broadcast %cst_52 : f32 to vector<8x64xf32>
    %117 = arith.maximumf %115, %116 : vector<8x64xf32>
    %118 = arith.truncf %117 : vector<8x64xf32> to vector<8x64xbf16>
    %c0_53 = arith.constant 0 : index
    %c0_54 = arith.constant 0 : index
    %c0_55 = arith.constant 0 : index
    %119 = vector.load %arg9[%c0_53, %c0_54, %c0_55] : memref<1x64x32xbf16, #tpu.memory_space<vmem>>, vector<1x64x32xbf16>
    %120 = vector.shape_cast %119 : vector<1x64x32xbf16> to vector<64x32xbf16>
    %cst_56 = arith.constant dense<0.000000e+00> : vector<8x32xf32>
    %121 = tpu.matmul %118, %120, %cst_56 {dimension_numbers = #tpu.dot_dimension_numbers<[1], [0], [0], [1], [0, 0, 1, 1], [], []>} : vector<8x64xbf16>, vector<64x32xbf16>, vector<8x32xf32> -> vector<8x32xf32>
    %122 = vector.broadcast %11 : vector<1x32xf32> to vector<8x32xf32>
    %123 = arith.addf %121, %122 : vector<8x32xf32>
    %124 = arith.addf %109, %123 : vector<8x32xf32>
    %cst_57 = arith.constant dense<0.000000e+00> : vector<8xf32>
    %125 = vector.multi_reduction <add>, %124, %cst_57 [1] : vector<8x32xf32> to vector<8xf32>
    %126 = vector.shape_cast %125 : vector<8xf32> to vector<8x1xf32>
    %cst_58 = arith.constant 3.200000e+01 : f32
    %127 = vector.broadcast %cst_58 : f32 to vector<8x1xf32>
    %128 = arith.divf %126, %127 : vector<8x1xf32>
    %129 = vector.broadcast %128 : vector<8x1xf32> to vector<8x32xf32>
    %130 = arith.subf %124, %129 : vector<8x32xf32>
    %131 = arith.mulf %130, %130 : vector<8x32xf32>
    %cst_59 = arith.constant dense<0.000000e+00> : vector<8xf32>
    %132 = vector.multi_reduction <add>, %131, %cst_59 [1] : vector<8x32xf32> to vector<8xf32>
    %133 = vector.shape_cast %132 : vector<8xf32> to vector<8x1xf32>
    %cst_60 = arith.constant 3.200000e+01 : f32
    %134 = vector.broadcast %cst_60 : f32 to vector<8x1xf32>
    %135 = arith.divf %133, %134 : vector<8x1xf32>
    %136 = vector.broadcast %128 : vector<8x1xf32> to vector<8x32xf32>
    %137 = arith.subf %124, %136 : vector<8x32xf32>
    %cst_61 = arith.constant 9.99999974E-6 : f32
    %138 = vector.broadcast %cst_61 : f32 to vector<8x1xf32>
    %139 = arith.addf %135, %138 : vector<8x1xf32>
    %140 = math.rsqrt %139 : vector<8x1xf32>
    %141 = vector.broadcast %140 : vector<8x1xf32> to vector<8x32xf32>
    %142 = arith.mulf %137, %141 : vector<8x32xf32>
    %143 = vector.broadcast %14 : vector<1x32xf32> to vector<8x32xf32>
    %144 = arith.mulf %142, %143 : vector<8x32xf32>
    %145 = vector.broadcast %15 : vector<1x32xf32> to vector<8x32xf32>
    %146 = arith.addf %144, %145 : vector<8x32xf32>
    %c0_62 = arith.constant 0 : index
    %c0_63 = arith.constant 0 : index
    %147 = vector.load %arg11[%c0_62, %c0_63] : memref<8x32xf32, #tpu.memory_space<vmem>>, vector<8x32xf32>
    tpu.vector_store %arg11[%c0_62, %c0_63], %146 {strides = array<i32>} : memref<8x32xf32, #tpu.memory_space<vmem>>, vector<8x32xf32>,
    return
  }
  func.func @transform_0(%arg0: i32, %arg1: i32) -> (i32, i32) {
    %c0_i32 = arith.constant 0 : i32
    %c0_i32_0 = arith.constant 0 : i32
    return %arg0, %c0_i32 : i32, i32
  }
  func.func @transform_1(%arg0: i32, %arg1: i32) -> (i32, i32, i32) {
    %c0_i32 = arith.constant 0 : i32
    %c0_i32_0 = arith.constant 0 : i32
    %c0_i32_1 = arith.constant 0 : i32
    return %arg0, %c0_i32, %c0_i32_0 : i32, i32, i32
  }
  func.func @transform_2(%arg0: i32, %arg1: i32) -> (i32, i32, i32) {
    %c0_i32 = arith.constant 0 : i32
    %c0_i32_0 = arith.constant 0 : i32
    %c0_i32_1 = arith.constant 0 : i32
    return %arg1, %c0_i32, %c0_i32_0 : i32, i32, i32
  }
  func.func @transform_3(%arg0: i32, %arg1: i32) -> (i32, i32, i32) {
    %c0_i32 = arith.constant 0 : i32
    %c0_i32_0 = arith.constant 0 : i32
    %c0_i32_1 = arith.constant 0 : i32
    return %arg1, %c0_i32, %c0_i32_0 : i32, i32, i32
  }
  func.func @transform_4(%arg0: i32, %arg1: i32) -> (i32, i32, i32) {
    %c0_i32 = arith.constant 0 : i32
    %c0_i32_0 = arith.constant 0 : i32
    %c0_i32_1 = arith.constant 0 : i32
    return %arg1, %c0_i32, %c0_i32_0 : i32, i32, i32
  }
  func.func @transform_5(%arg0: i32, %arg1: i32) -> (i32, i32, i32) {
    %c0_i32 = arith.constant 0 : i32
    %c0_i32_0 = arith.constant 0 : i32
    %c0_i32_1 = arith.constant 0 : i32
    return %arg1, %c0_i32, %c0_i32_0 : i32, i32, i32
  }
  func.func @transform_6(%arg0: i32, %arg1: i32) -> (i32, i32, i32) {
    %c0_i32 = arith.constant 0 : i32
    %c0_i32_0 = arith.constant 0 : i32
    %c0_i32_1 = arith.constant 0 : i32
    return %arg1, %c0_i32, %c0_i32_0 : i32, i32, i32
  }
  func.func @transform_7(%arg0: i32, %arg1: i32) -> (i32, i32, i32) {
    %c0_i32 = arith.constant 0 : i32
    %c0_i32_0 = arith.constant 0 : i32
    %c0_i32_1 = arith.constant 0 : i32
    return %arg1, %c0_i32, %c0_i32_0 : i32, i32, i32
  }
  func.func @transform_8(%arg0: i32, %arg1: i32) -> (i32, i32, i32) {
    %c0_i32 = arith.constant 0 : i32
    %c0_i32_0 = arith.constant 0 : i32
    %c0_i32_1 = arith.constant 0 : i32
    return %arg1, %c0_i32, %c0_i32_0 : i32, i32, i32
  }
  func.func @transform_9(%arg0: i32, %arg1: i32) -> (i32, i32) {
    %c0_i32 = arith.constant 0 : i32
    %c0_i32_0 = arith.constant 0 : i32
    return %arg0, %c0_i32 : i32, i32
  }
  func.func @transform_10(%arg0: i32, %arg1: i32) -> (i32, i32, i32, i32) {
    %c0_i32 = arith.constant 0 : i32
    %c0_i32_0 = arith.constant 0 : i32
    %c0_i32_1 = arith.constant 0 : i32
    return %arg1, %arg0, %c0_i32, %c0_i32_0 : i32, i32, i32, i32
  }
}

</mosaic_0001>

<bundles_post_ra>
// kernel: peter_forward.3
= control target key start
LH: loop header
LB: loop body
LE: loop exit
PB: predicated region body
PF: predicated region fallthrough
CT: control target
= control target key end

     0   :  { %s565_s0 = inlined_call_operand.vmem [shape: f32[12,32], index: 0, kind: input, shape index: {}]   ;;  %s566_s1 = inlined_call_operand.vmem [shape: bf16[32,128], index: 1, kind: input, shape index: {}]   ;;  %s567_s2 = inlined_call_operand.vmem [shape: f32[1,128], index: 2, kind: input, shape index: {}]   ;;  %s568_s3 = inlined_call_operand.vmem [shape: f32[2,32], index: 3, kind: input, shape index: {}]   ;;  %s569_s4 = inlined_call_operand.vmem [shape: f32[32,32], index: 4, kind: input, shape index: {}]   ;;  %s570_s5 = inlined_call_operand.vmem [shape: f32[1,32], index: 5, kind: input, shape index: {}]   ;;  %s571_s6 = inlined_call_operand.vmem [shape: f32[1,32], index: 6, kind: input, shape index: {}]   ;;  %s572_s7 = inlined_call_operand.<no memory space> [shape: f32[1,1], index: 7, kind: input, shape index: {}]   ;;  %s573_s8 = inlined_call_operand.vmem [shape: f32[12,128], index: 8, kind: output, shape index: {0}]   ;;  %s574_s9 = inlined_call_operand.vmem [shape: f32[2,1], index: 9, kind: output, shape index: {1}]   ;;  %s575_s10 = inlined_call_operand.hbm [shape: f32[12,1], index: 10, kind: output, shape index: {2}]  }
   0x1   :  { %v16_v0 = vstv %s572_s7 }
   0x2   :  { %17 = vst [vmem:[#allocation4] sm:$0x1] %v16_v0 }
   0x3   :  { %v387_v1 = vld [vmem:[%s566_s1 + $0x8] sm:$0xff]   ;;  %v427_v2 = vmov 0.0   ;;  %v388_v3 = vld [vmem:[%s566_s1] sm:$0xff]   ;;  %vm428_vm0 = vmmov 0  }
   0x4   :  { %370 = vmatprep.subr.bf16.mxu1 %v427_v2  ;;  %359 = vmatprep.subr.mxu0 %v427_v2  ;;  %v160_v4 = vld [vmem:[%s565_s0] sm:$0xff]  ;;  %v161_v5 = vld [vmem:[%s565_s0 + $0x8] sm:$0xf] }
   0x5   :  { %371 = vmatpush3.bf16.msra.mxu1 %v387_v1  ;;  %374 = vmatprep.mubr.msk.bf16.mxu1 %vm428_vm0, %v427_v2 }
   0x6   :  { %372 = vmatprep.subr.bf16.mxu1 %v427_v2  ;;  %367 = vmatprep.mubr.msk.f32.mxu0 %vm428_vm0, %v427_v2 }
   0x7   :  { %18 = vsyncpa [#allocation6], 0  ;;  %v162_v6 = vpack.c.bf16 %v161_v5, %v160_v4  ;;  %vm58_vm1 = vcmask 261120   ;;  %v347_v9 = vld [vmem:[%s567_s2] ss:$0 sm:$0xff]  ;;  %vm241_vm2 = vcmask 1043456  }
   0x8   :  { %vm42_vm3 = vcmask 3072   ;;  %v429_v15 = vmov -inf   ;;  %vm40_vm4 = vcmask 7168   ;;  %v430_v16 = vmov 0   ;;  %v50_v17 = vld [vmem:[%s569_s4 + $0x18] sm:$0xff]  ;;  %v49_v18 = vld [vmem:[%s569_s4 + $0x10] sm:$0xff] }
   0x9   :  { %373 = vmatpush3.bf16.msra.mxu1 %v388_v3  ;;  %43 = vst.msk [vmem:[#allocation2 + $0x8] sm:$0xf] %vm42_vm3, %v429_v15  ;;  %45 = vst.msk [vmem:[#allocation3 + $0x8] sm:$0xf] %vm42_vm3, %v427_v2  ;;  %385 = vset.pattern.permute.xlu1 %v430_v16  ;;  %v48_v19 = vld [vmem:[%s569_s4 + $0x8] sm:$0xff]  ;;  %v47_v20 = vld [vmem:[%s569_s4] sm:$0xff] }
   0xa   :  { %41 = vst.msk [vmem:[#allocation2] sm:$0xff] %vm40_vm4, %v429_v15  ;;  %44 = vst.msk [vmem:[#allocation3] sm:$0xff] %vm40_vm4, %v427_v2  ;;  %386 = vset.pattern.permute.xlu0 %v430_v16  ;;  %360 = vmatpush3.msra.mxu0 %v50_v17  ;;  %v46_v21 = vld [vmem:[%s568_s3] sm:$0x3]  ;;  %vm146_vm5 = vcmask 254976   ;;  %vm158_vm6 = vcmask 1024  }
   0xb   :  { %361 = vmatprep.subr.mxu0 %v427_v2  ;;  %v342_v32 = vld [vmem:[%s570_s5] ss:$0 sm:$0xff]  ;;  %s431_s15 = smov [#allocation5]  }
   0xc   :  { %375 = vmatmul.mubr.msk.bf16.vlgmr.msra.gmra.mxu1 %vm58_vm1, %v162_v6  ;;  %362 = vmatpush3.msra.mxu0 %v49_v18  ;;  %v345_v47 = vld [vmem:[%s571_s6] ss:$0 sm:$0xff]  ;;  %s326_s16 = sshll.u32 %s431_s15, 4  ;;  %s327_s16 = int_to_ptr.vmem [resolvable:$true] %s326_s16 }
   0xd   :  { %363 = vmatprep.subr.mxu0 %v427_v2  ;;  %v346_v0 = vld [vmem:[#allocation4] ss:$0 sm:$0xff]  ;;  %s405_s17 = scalar_lea.vmem %s327_s16, 256  ;;  %p410_p1 = scmp.lt.s32.totalorder %s327_s16, %s327_s16 }
   0xe   :  { %364 = vmatpush3.msra.mxu0 %v48_v19  ;;  %p406_p0 = scmp.ne.s32.totalorder %s327_s16, %s405_s17  ;;  %p411_p2 = scmp.lt.s32.totalorder %s405_s17, %s405_s17 }
   0xf   :  { %365 = vmatprep.subr.mxu0 %v427_v2 }
  0x10   :  { %366 = vmatpush3.msra.mxu0 %v47_v20  ;;  %v238_v22 = vld [vmem:[#allocation2 + $0x8] sm:$0xf]  ;;  %v248_v53 = vld [vmem:[#allocation3 + $0x8] sm:$0xf]  ;;  %p412_p3 = por %p411_p2, %p410_p1 }
  0x11   :  { %368 = vmatmul.mubr.msk.f32.vlgmr.msra.gmra.mxu0 %vm58_vm1, %v46_v21  ;;  %v237_v25 = vld [vmem:[#allocation2] sm:$0xff]  ;;  %v247_v56 = vld [vmem:[#allocation3] sm:$0xff] }
  0x12   :  { %p413_p4 = pnand %p412_p3, %p406_p0 }
  0xcc   :  { %v224_v7 = vpop.f32.mrf.mxu1 }
  0xcd   :  { %v512_v14 = vadd.f32 %v347_v9, %v224_v7 }
  0xce   :  { %v376_v8 = vpop.f32.mrf.mxu1 }
  0xd0   :  { %v227_v10 = vpop.f32.mrf.mxu1 }
  0xd1   :  { %v228_v11 = vadd.f32 %v347_v9, %v227_v10  ;;  %v128_v30 = vpop.f32.mrf.mxu0 }
  0xd2   :  { %v377_v12 = vpop.f32.mrf.mxu1  ;;  %v129_v33 = vadd.f32 %v342_v32, %v128_v30 }
  0xd3   :  { %236 = vst [vmem:[%s573_s8 + $0x8] sm:$0xf] %v228_v11  ;;  %v242_v13 = vsel %vm241_vm2, %v228_v11, -inf  ;;  %v369_v31 = vpop.f32.mrf.mxu0 }
  0xd4   :  { %243 = vmax.xlane.f32.xlu0 %v242_v13  ;;  %v344_v34 = vmul.f32 -1.442695, %v129_v33 }
  0xd6   :  { %389 = vpow2.f32 %v344_v34 }
  0xd8   :  { %239 = vmax.xlane.f32.xlu0 %v512_v14 }
  0xe3   :  { %v390_v41 = vpop.eup %389 }
  0xe4   :  { %v135_v42 = vadd.f32 1.0, %v390_v41 }
 0x15d   :  { %v244_v23 = vpop.xlane.xlu0 %243 }
 0x15e   :  { %v246_v24 = vmax.f32 %v238_v22, %v244_v23 }
 0x160   :  { %v250_v26 = vsub.f32 %v238_v22, %v246_v24  ;;  %285 = vst.msk [vmem:[#allocation2 + $0x8] sm:$0xf] %vm42_vm3, %v246_v24  ;;  %264 = vperm.xlu1 %385, %v246_v24  }
 0x161   :  { %v240_v27 = vpop.xlane.xlu0 %239 }
 0x162   :  { %v245_v28 = vmax.f32 %v237_v25, %v240_v27  ;;  %v253_v50 = vmul.f32 1.442695, %v250_v26 }
 0x164   :  { %v249_v29 = vsub.f32 %v237_v25, %v245_v28  ;;  %284 = vst.msk [vmem:[#allocation2] sm:$0xff] %vm40_vm4, %v245_v28  ;;  %259 = vperm.xlu1 %385, %v245_v28  }
 0x166   :  { %v251_v51 = vmul.f32 1.442695, %v249_v29 }
 0x167   :  { %v290_v5 = vld [vmem:[#allocation2 + $0x8] sm:$0xf] }
 0x16b   :  { %v289_v9 = vld [vmem:[#allocation2] sm:$0xff] }
 0x1db   :  { %v265_v35 = vpop.permute.xlu1 %264 }
 0x1dc   :  { %v268_v36 = vsub.f32 %v228_v11, %v265_v35 }
 0x1de   :  { %v271_v37 = vmul.f32 1.442695, %v268_v36 }
 0x1df   :  { %v260_v38 = vpop.permute.xlu1 %259 }
 0x1e0   :  { %391 = vpow2.f32 %v271_v37  ;;  %v267_v39 = vsub.f32 %v512_v14, %v260_v38 }
 0x1e2   :  { %v269_v40 = vmul.f32 1.442695, %v267_v39 }
 0x1e4   :  { %393 = vpow2.f32 %v269_v40 }
 0x1e5   :  { %395 = vrcp.f32 %v135_v42 }
 0x1e6   :  { %397 = vpow2.f32 %v253_v50 }
 0x1e7   :  { %399 = vpow2.f32 %v251_v51 }
 0x1ed   :  { %v392_v43 = vpop.eup %391 }
 0x1ee   :  { %v275_v44 = vsel %vm241_vm2, %v392_v43, 0.0 }
 0x1ef   :  { %276 = vadd.xlane.f32.xlu1 %v275_v44 }
 0x1f1   :  { %v394_v45 = vpop.eup %393 }
 0x1f2   :  { %273 = vadd.xlane.f32.xlu0 %v394_v45  ;;  %v396_v46 = vpop.eup %395 }
 0x1f3   :  { %v145_v48 = vmul.f32 %v396_v46, %v345_v47  ;;  %v398_v52 = vpop.eup %397 }
 0x1f4   :  { %v400_v54 = vpop.eup %399  ;;  %v256_v55 = vmul.f32 %v398_v52, %v248_v53 }
 0x1f5   :  { %v147_v49 = vsel %vm146_vm5, %v145_v48, 0.0  ;;  %v255_v59 = vmul.f32 %v400_v54, %v247_v56 }
 0x1f6   :  { %148 = vadd.xlane.f32.xlu0 %v147_v49 }
 0x278   :  { %v277_v57 = vpop.xlane.xlu1 %276 }
 0x279   :  { %v279_v58 = vadd.f32 %v277_v57, %v256_v55 }
 0x27b   :  { %283 = vst.msk [vmem:[#allocation3 + $0x8] sm:$0xf] %vm42_vm3, %v279_v58  ;;  %v274_v60 = vpop.xlane.xlu0 %273 }
 0x27c   :  { %v278_v61 = vadd.f32 %v274_v60, %v255_v59 }
 0x27e   :  { %281 = vst.msk [vmem:[#allocation3] sm:$0xff] %vm40_vm4, %v278_v61 }
 0x27f   :  { %v149_v1 = vpop.xlane.xlu0 %148 }
 0x280   :  { %v157_v2 = vadd.f32 %v346_v0, %v149_v1 }
 0x282   :  { %v292_v62 = vld [vmem:[#allocation3 + $0x8] sm:$0xf]  ;;  %159 = vst.msk [vmem:[%s574_s9] sm:$0x3] %vm158_vm6, %v157_v2 }
 0x283   :  { %401 = vlog2.f32 %v292_v62 }
 0x285   :  { %v291_v63 = vld [vmem:[#allocation3] sm:$0xff] }
 0x286   :  { %403 = vlog2.f32 %v291_v63 }
 0x290   :  { %v402_v3 = vpop.eup %401 }
 0x291   :  { %v296_v4 = vmul.f32 0.6931472, %v402_v3 }
 0x293   :  { %v404_v6 = vpop.eup %403  ;;  %v298_v7 = vadd.f32 %v296_v4, %v290_v5 }
 0x294   :  { %v294_v8 = vmul.f32 0.6931472, %v404_v6 }
 0x295   :  { %310 = vperm.xlu1 %385, %v298_v7   ;;  %300 = vst.msk [vmem:[#allocation5 + $0x8] sm:$0xf] %vm42_vm3, %v298_v7 }
 0x296   :  { %v297_v10 = vadd.f32 %v294_v8, %v289_v9 }
 0x298   :  { %305 = vperm.xlu0 %386, %v297_v10   ;;  %299 = vst.msk [vmem:[#allocation5] sm:$0xff] %vm40_vm4, %v297_v10 }
 0x299   :  { %416 = shalt.err (!%p413_p4)
}
 0x29a   :  { %s432_s9 = smov 128   ;;  %s433_s18 = smov 8   ;;  %v302_v11 = vld [vmem:[%s573_s8 + $0x8] sm:$0xf] }
 0x29b   :  { %332 = dma.vmem_to_hbm [thread:$0]  %s327_s16, 256, %s575_s10, [#allocation6], %s432_s9, %s432_s9, %s433_s18  }
 0x310   :  { %v311_v12 = vpop.permute.xlu1 %310 }
 0x311   :  { %v314_v13 = vsub.f32 %v302_v11, %v311_v12 }
 0x313   :  { %316 = vst [vmem:[%s573_s8 + $0x8] sm:$0xf] %v314_v13  ;;  %v306_v15 = vpop.permute.xlu0 %305 }
 0x314   :  { %v313_v16 = vsub.f32 %v512_v14, %v306_v15 }
 0x316   :  { %315 = vst [vmem:[%s573_s8] sm:$0xff] %v313_v16 }
 0x317   :  { %425 = dma.done.wait [#allocation6], 256  }
 0x318   :  { %426 = vsyncadd [#allocation6], 4294967040 }
 0x319   :  { %340 = vsyncpa [#allocation6], 1 }

// kernel: peter_forward.2
= control target key start
LH: loop header
LB: loop body
LE: loop exit
PB: predicated region body
PF: predicated region fallthrough
CT: control target
= control target key end

     0   :  { %s2263_s0 = inlined_call_operand.vmem [shape: f32[16,32], index: 0, kind: input, shape index: {}]   ;;  %s2264_s1 = inlined_call_operand.vmem [shape: f32[2,8,8], index: 1, kind: input, shape index: {}]   ;;  %s2265_s2 = inlined_call_operand.vmem [shape: bf16[2,32,32], index: 2, kind: input, shape index: {}]   ;;  %s2266_s3 = inlined_call_operand.vmem [shape: bf16[2,32,32], index: 3, kind: input, shape index: {}]   ;;  %s2267_s4 = inlined_call_operand.vmem [shape: bf16[2,32,32], index: 4, kind: input, shape index: {}]   ;;  %s2268_s5 = inlined_call_operand.vmem [shape: bf16[2,32,32], index: 5, kind: input, shape index: {}]   ;;  %s2269_s6 = inlined_call_operand.vmem [shape: bf16[2,32,64], index: 6, kind: input, shape index: {}]   ;;  %s2270_s7 = inlined_call_operand.vmem [shape: bf16[2,64,32], index: 7, kind: input, shape index: {}]   ;;  %s2271_s8 = inlined_call_operand.vmem [shape: f32[2,10,64], index: 8, kind: input, shape index: {}]   ;;  %s2272_s9 = inlined_call_operand.vmem [shape: f32[16,32], index: 9, kind: output, shape index: {0}]   ;;  %s2273_s10 = inlined_call_operand.hbm [shape: f32[2,2,8,128], index: 10, kind: output, shape index: {1}]  }
   0x1   :  { %2288 = sst [smem:[#allocation17_spill]] %s2263_s0 }
   0x2   :  { %2289 = sst [smem:[#allocation18_spill]] %s2265_s2 }
   0x3   :  { %2290 = sst [smem:[#allocation19_spill]] %s2266_s3 }
   0x4   :  { %2291 = sst [smem:[#allocation20_spill]] %s2273_s10 }
   0x5   :  { %16 = vsyncpa [#allocation4], 0 }
   0x6   :  { %18 = vsyncpa [#allocation4 + $0x1], 0  ;;  %s1967_s13 = smov 0   ;;  %s1969_s14 = smov 0  }
   0x7   :  { %s1971_s15 = smov 0   ;;  %s1973_s16 = smov 0  }
   0x8   :  { %s1975_s17 = smov 0   ;;  %s1977_s18 = smov 0  }
   0x9   :  { %s1979_s19 = smov 0   ;;  %s1981_s20 = smov 0  }
   0xa LB: > { %2292 = sst [smem:[#allocation6_spill]] %s1877_s13  ;;  %s1550_s21 = sadd.s32 4294967295, %s1905_s20   ;;  %s1905_s20 = sphi %s1981_s20, %s24_s20   ;;  %s1901_s19 = sphi %s1979_s19, %s2323_s19   ;;  %s1897_s18 = sphi %s1977_s18, %s2322_s18   ;;  %s1893_s17 = sphi %s1975_s17, %s2321_s17   ;;  %s1889_s16 = sphi %s1973_s16, %s2320_s16   ;;  %s1885_s15 = sphi %s1971_s15, %s2319_s15   ;;  %s1881_s14 = sphi %s1969_s14, %s2318_s14   ;;  %s1877_s13 = sphi %s1967_s13, %s2317_s13  }
   0xb   : > { %2293 = sst [smem:[#allocation7_spill]] %s1881_s14  ;;  %s1551_s22 = sadd.s32 4294967294, %s1905_s20  }
   0xc   : > { %2294 = sst [smem:[#allocation8_spill]] %s1885_s15  ;;  %s33_s23 = sadd.s32 1, %s1897_s18 }
   0xd   : > { %2295 = sst [smem:[#allocation9_spill]] %s1897_s18  ;;  %p34_p0 = scmp.ge.s32.totalorder %s33_s23, 2 }
   0xe   : > { %2296 = sst [smem:[#allocation10_spill]] %s1901_s19  ;;  %s36_s24 = sadd.s32 1, %s1901_s19 }
   0xf   : > { %2297 = sst [smem:[#allocation11_spill]] %s1905_s20  ;;  %p315_p1 = scmp.ne.s32.totalorder %s1885_s15, %s1881_s14 }
  0x10   : > { %p316_p2 = scmp.eq.s32.totalorder %s1550_s21, 3  ;;  %s2325_s23 = smov (%p34_p0, %s33_s23), 0 }
  0x11   : > { %2298 = sst [smem:[#allocation12_spill]] %s2325_s23  ;;  %s2327_s24 = smov (!%p34_p0, %s36_s24), %s1901_s19 }
  0x12   : > { %s300_s25 = ssub.s32 %s1897_s18, %s2325_s23  ;;  %p2018_p3 = por %p316_p2, %p315_p1 }
  0x13   : > { %p38_p4 = scmp.ge.s32.totalorder %s2327_s24, 2  ;;  %p321_p5 = scmp.ne.s32.totalorder %s1881_s14, %s1877_s13 }
  0x14   : > { %s2299_s26 = scalar_select %p2018_p3, 1, 0 }
  0x15   : > { %p322_p6 = scmp.eq.s32.totalorder %s1551_s22, 3  ;;  %p1554_p7 = scmp.ge.s32.totalorder %s1905_s20, 1 }
  0x16   : > { %2300 = sst [smem:[#allocation13_spill]] %s2299_s26  ;;  %s2329_s24 = smov (%p38_p4, %s2327_s24), 0 }
  0x17   : > { %2301 = sst [smem:[#allocation14_spill]] %s2329_s24  ;;  %p2027_p8 = por %p322_p6, %p321_p5 }
  0x18   : > { %p410_p9 = scmp.lt.s32.totalorder %s1905_s20, 5  ;;  %s301_s28 = ssub.s32 %s1901_s19, %s2329_s24 }
  0x19   : > { %s2302_s27 = scalar_select %p2027_p8, 1, 0 }
  0x1a   : > { %s305_s29 = sadd.s32 1, %s1885_s15  ;;  %s302_s30 = sor.u32 %s301_s28, %s300_s25 }
  0x1b   : > { %2303 = sst [smem:[#allocation15_spill]] %s2302_s27  ;;  %p411_p10 = pnand %p1554_p7, %p410_p9 }
  0x1c   : > { %p303_p11 = scmp.eq.s32.totalorder %s302_s30, 0  ;;  %s2278_s12 = sand.u32 (!%p411_p10), 1, %s1881_s14  }
  0x1d   : > { %414 = sbr.rel (%p411_p10) target bundleno = 2417 (0x971), region = 56  ;;  %p490_p12 = scmp.lt.s32.totalorder (!%p411_p10), %s1893_s17, 1 }
  0x1e   : > { %s2036_s11 = scalar_select %p303_p11, %s1885_s15, %s305_s29  }
  0x1f   : > { %s2042_s21 = sshll.u32 (!%p411_p10), %s2278_s12, 3  ;;  %p498_p13 = scmp.lt.s32.totalorder (!%p411_p10), %s1889_s16, 1 }
  0x20   : > { %2304 = sst [smem:[#allocation16_spill]] %s2036_s11  ;;  %s489_s30 = scalar_lea.vmem (!%p411_p10), [#allocation3], %s2042_s21 }
  0x21   : > { %s2305_s0 = sld [smem:[#allocation17_spill]] (!%p411_p10)  ;;  %p1573_p0 = scmp.ne.s32.totalorder (!%p411_p10), %s1889_s16, 0 }
  0x22   : > { %s491_s22 = scalar_select %p490_p12, %s1893_s17, 1 }
  0x23   : > { %s499_s25 = scalar_select %p498_p13, %s1889_s16, 1 }
  0x24   : > { %s2047_s28 = sshll.u32 %s491_s22, 3  ;;  %s2306_s2 = sld [smem:[#allocation18_spill]] }
  0x25   : > { %s1605_s11 = sshll.u32 %s499_s25, 4  ;;  %s1610_s12 = sshll.u32 %s499_s25, 5 }
  0x26   : > { %s2307_s3 = sld [smem:[#allocation19_spill]]  ;;  %s2066_s29 = scalar_lea.vmem %s2267_s4, %s1605_s11 }
  0x27   : > { %s493_s24 = scalar_lea.vmem %s2305_s0, %s2047_s28  ;;  %s2071_s19 = scalar_lea.vmem %s2268_s5, %s1605_s11 }
  0x28   : > { %s2076_s18 = scalar_lea.vmem %s2269_s6, %s1605_s11  ;;  %s2081_s20 = scalar_lea.vmem %s2270_s7, %s1610_s12 }
  0x29   : > { %s2086_s14 = scalar_lea.vmem %s2271_s8, %s1605_s11  ;;  %s2092_s0 = scalar_lea.vmem %s2272_s9, %s2047_s28 }
  0x2a   : > { %s502_s13 = scalar_lea.vmem %s2306_s2, %s1605_s11  ;;  %541 = sbr.rel (%p1573_p0) target bundleno = 49 (0x31), region = 60 }
  0x2c   : > { %s507_s10 = scalar_lea.vmem %s2307_s3, %s1605_s11 }
  0x2f   : > { %v542_v0 = vld [vmem:[%s493_s24] sm:$0xff]  ;;  %vm543_vm0 = vcmask 261120  }
  0x30   : > { %544 = vst.msk [vmem:[%s2092_s0] sm:$0xff] %vm543_vm0, %v542_v0 }
  0x31 PF: > { %v1787_v1 = vld [vmem:[%s502_s13 + $0x8] sm:$0xff]   ;;  %v1907_v2 = vmov 0.0   ;;  %v1788_v3 = vld [vmem:[%s502_s13] sm:$0xff]   ;;  %vm1908_vm1 = vmmov 0   ;;  %vm569_vm2 = vcmask 261120   ;;  %v553_v10 = vlaneseq  ;;  %s1909_s2 = smov 112   ;;  %s2308_s13 = scalar_lea.vmem %s2264_s1, %s2047_s28 }
  0x32   : > { %1640 = vmatprep.subr.bf16.mxu1 %v1907_v2  ;;  %1656 = vmatprep.subr.bf16.mxu0 %v1907_v2  ;;  %v1789_v6 = vld [vmem:[%s507_s10 + $0x8] sm:$0xff]   ;;  %v1790_v7 = vld [vmem:[%s507_s10] sm:$0xff]   ;;  %vm735_vm3 = vcmask 130048   ;;  %vm812_vm4 = vcmask 64512   ;;  %s1910_s24 = smov 16   ;;  %vm1070_vm5 = vcmask 261248  }
  0x33   : > { %1641 = vmatpush3.bf16.msra.mxu1 %v1787_v1  ;;  %1644 = vmatprep.mubr.msk.bf16.mxu1 %vm1908_vm1, %v1907_v2  ;;  %v1791_v8 = vld [vmem:[%s2066_s29 + $0x8] sm:$0xff]   ;;  %v1792_v9 = vld [vmem:[%s2066_s29] sm:$0xff]   ;;  %v2125_v11 = vshrl.u32 %v553_v10, 7  ;;  %vm1266_vm6 = vcmask 523264   ;;  %s1601_s12 = sshll.u32 %s1889_s16, 1  ;;  %s2311_s15 = sld [smem:[#allocation20_spill]] }
  0x34   : > { %1642 = vmatprep.subr.bf16.mxu1 %v1907_v2  ;;  %1660 = vmatprep.mubr.msk.bf16.mxu0 %vm1908_vm1, %v1907_v2  ;;  %v2129_v14 = vld [vmem:[%s2086_s14] sm:$0xff]  ;;  %s1354_s28 = sadd.s32 %s1893_s17, %s1601_s12  ;;  %s1911_s3 = smov [#allocation3]  }
  0x35   : > { %1657 = vmatpush3.bf16.msra.mxu0 %v1791_v8  ;;  %v555_v12 = vsub.s32 0, %v2125_v11  ;;  %v620_v15 = vsub.s32 1, %v2125_v11  ;;  %v680_v28 = vsub.s32 2, %v2125_v11  ;;  %v734_v37 = vld [vmem:[%s2308_s13] sm:$0xff]  ;;  %s1602_s29 = sshll.u32 %s1354_s28, 7  ;;  %s1817_s10 = sshll.u32 %s1911_s3, 4  ;;  %s1818_s10 = int_to_ptr.vmem [resolvable:$false] %s1817_s10 }
  0x36   : > { %1658 = vmatprep.subr.bf16.mxu0 %v1907_v2  ;;  %s1819_s16 = scalar_lea.vmem %s1818_s10, 256 }
  0x37   : > { %v2102_v4 = vld [vmem:[%s2092_s0] sm:$0xff]  ;;  %1643 = vmatpush3.bf16.msra.mxu1 %v1788_v3  ;;  %v556_v17 = vrot.slane %v2129_v14, %v555_v12  ;;  %v621_v19 = vrot.slane %v2129_v14, %v620_v15  ;;  %v681_v29 = vrot.slane %v2129_v14, %v680_v28 }
  0x38   : > { %v548_v5 = vpack.c.bf16 %v2102_v4, %v2102_v4  ;;  %1648 = vmatprep.subr.bf16.mxu1 %v1907_v2 }
  0x39   : > { %1659 = vmatpush3.bf16.msra.mxu0 %v1792_v9  ;;  %s2312_s27 = smov %s2311_s15 }
  0x3a   : > { %1645 = vmatmul.mubr.msk.bf16.vlgmr.msra.gmra.mxu1 %vm569_vm2, %v548_v5  ;;  %1674 = vmatprep.subr.mxu0 %v1907_v2 }
  0x3b   : > { %1649 = vmatpush3.bf16.msra.mxu1 %v1789_v6  ;;  %1652 = vmatprep.mubr.msk.bf16.mxu1 %vm1908_vm1, %v1907_v2  ;;  %v1794_v6 = vld [vmem:[%s2071_s19] sm:$0xff]  }
  0x3c   : > { %1650 = vmatprep.subr.bf16.mxu1 %v1907_v2  ;;  %1661 = vmatmul.mubr.msk.bf16.vlgmr.msra.gmra.mxu0 %vm569_vm2, %v548_v5 }
  0x3d   : > { %1676 = vmatprep.mubr.msk.f32.mxu0 %vm1908_vm1, %v1907_v2 }
  0x3f   : > { %1651 = vmatpush3.bf16.msra.mxu1 %v1790_v7 }
  0x40   : > { %1664 = vmatprep.subr.mxu1 %v1907_v2 }
  0x42   : > { %1653 = vmatmul.mubr.msk.bf16.vlgmr.msra.gmra.mxu1 %vm569_vm2, %v548_v5  ;;  %v1793_v5 = vld [vmem:[%s2071_s19 + $0x8] sm:$0xff]   ;;  %s1358_s19 = sshll.u32 %s489_s30, 4  ;;  %s1359_s19 = int_to_ptr.vmem [resolvable:$true] %s1358_s19 }
  0x43   : > { %1666 = vmatprep.mubr.msk.f32.mxu1 %vm1908_vm1, %v1907_v2  ;;  %p1820_p5 = scmp.lt.s32.totalorder %s1359_s19, %s1818_s10 }
  0xfa   : > { %v607_v13 = vpop.f32.mrf.mxu1 }
  0xfb   : > { %v608_v21 = vadd.f32 %v607_v13, %v556_v17 }
  0xfc   : > { %v1646_v16 = vpop.f32.mrf.mxu1  ;;  %v728_v30 = vpop.f32.mrf.mxu0 }
  0xfd   : > { %v613_v25 = vmul.f32 0.25, %v608_v21  ;;  %v729_v31 = vadd.f32 %v728_v30, %v681_v29  ;;  %v1082_v16 = vsub.s32 3, %v2125_v11  ;;  %v1795_v30 = vld [vmem:[%s2076_s18 + $0x8] sm:$0xff]  }
  0xfe   : > { %v610_v18 = vpop.f32.mrf.mxu1  ;;  %v1662_v32 = vpop.f32.mrf.mxu0 }
  0xff   : > { %v1083_v17 = vrot.slane %v2129_v14, %v1082_v16  ;;  %v1798_v32 = vld [vmem:[%s2081_s20 + $0x10] sm:$0xff]  }
 0x100   : > { %v1647_v20 = vpop.f32.mrf.mxu1  ;;  %v731_v33 = vpop.f32.mrf.mxu0 }
 0x102   : > { %v668_v22 = vpop.f32.mrf.mxu1  ;;  %v1663_v34 = vpop.f32.mrf.mxu0 }
 0x103   : > { %v669_v23 = vadd.f32 %v668_v22, %v621_v19 }
 0x104   : > { %v1654_v24 = vpop.f32.mrf.mxu1 }
 0x105   : > { %901 = vrot.lane.b32.xlu0 %v669_v23, %s1909_s2  ;;  %1665 = vmatpush3.xpose.msk.msra.mxu1 %vm735_vm3, %v669_v23 }
 0x106   : > { %v671_v26 = vpop.f32.mrf.mxu1  ;;  %1669 = vmatprep.subr.mxu1 %v1907_v2 }
 0x108   : > { %v1655_v27 = vpop.f32.mrf.mxu1  ;;  %1667 = vmatmul.mubr.msk.f32.vlgmr.msra.gmra.mxu1 %vm735_vm3, %v613_v25 }
 0x109   : > { %899 = vrot.lane.b32.xlu0 %v613_v25, %s1909_s2  ;;  %1671 = vmatprep.mubr.msk.f32.mxu1 %vm1908_vm1, %v1907_v2 }
 0x10a   : > { %1670 = vmatpush3.msra.mxu1 %v729_v31 }
 0x10b   : > { %1679 = vmatprep.subr.mxu1 %v1907_v2 }
 0x177   : > { %v902_v35 = vpop.permute.xlu0 %901 }
 0x178   : > { %1675 = vmatpush3.xpose.msk.msra.mxu0 %vm735_vm3, %v902_v35 }
 0x179   : > { %1684 = vmatprep.subr.bf16.mxu0 %v1907_v2 }
 0x17b   : > { %v900_v36 = vpop.permute.xlu0 %899 }
 0x17c   : > { %1677 = vmatmul.mubr.msk.f32.vlgmr.msra.gmra.mxu0 %vm735_vm3, %v900_v36  ;;  %v1156_v36 = vsub.s32 6, %v2125_v11 }
 0x17d   : > { %1688 = vmatprep.mubr.msk.bf16.mxu0 %vm1908_vm1, %v1907_v2  ;;  %1685 = vmatpush3.bf16.msra.mxu0 %v1793_v5 }
 0x17e   : > { %1686 = vmatprep.subr.bf16.mxu0 %v1907_v2 }
 0x181   : > { %1687 = vmatpush3.bf16.msra.mxu0 %v1794_v6 }
 0x182   : > { %1700 = vmatprep.subr.bf16.mxu0 %v1907_v2 }
 0x1c8   : > { %v808_v38 = vpop.f32.mrf.mxu1 }
 0x1c9   : > { %v809_v39 = vadd.f32 %v808_v38, %v734_v37  ;;  %v1157_v38 = vrot.slane %v2129_v14, %v1156_v36 }
 0x1ca   : > { %v1668_v40 = vpop.f32.mrf.mxu1 }
 0x1cb   : > { %v813_v41 = vsel %vm812_vm4, %v809_v39, -inf }
 0x1cc   : > { %814 = vmax.xlane.f32.xlu1 %v813_v41 }
 0x23c   : > { %v973_v42 = vpop.f32.mrf.mxu0 }
 0x23d   : > { %v974_v43 = vadd.f32 %v973_v42, %v734_v37  ;;  %v1161_v37 = vsub.s32 7, %v2125_v11 }
 0x23e   : > { %v1678_v44 = vpop.f32.mrf.mxu0 }
 0x23f   : > { %v977_v45 = vsel %vm812_vm4, %v974_v43, -inf  ;;  %v1162_v41 = vrot.slane %v2129_v14, %v1161_v37 }
 0x240   : > { %978 = vmax.xlane.f32.xlu1 %v977_v45  ;;  %v1799_v45 = vld [vmem:[%s2081_s20 + $0x8] sm:$0xff]  }
 0x255   : > { %v815_v46 = vpop.xlane.xlu1 %814 }
 0x256   : > { %v816_v47 = vsub.f32 %v809_v39, %v815_v46  ;;  %v1800_v46 = vld [vmem:[%s2081_s20] sm:$0xff]  }
 0x258   : > { %v817_v48 = vmul.f32 1.442695, %v816_v47  ;;  %v1171_v47 = vsub.s32 4, %v2125_v11 }
 0x25a   : > { %1801 = vpow2.f32 %v817_v48  ;;  %v1172_v48 = vrot.slane %v2129_v14, %v1171_v47 }
 0x267   : > { %v1802_v49 = vpop.eup %1801 }
 0x268   : > { %v819_v50 = vsel %vm812_vm4, %v1802_v49, 0.0 }
 0x269   : > { %820 = vadd.xlane.f32.xlu0 %v819_v50 }
 0x2c9   : > { %v979_v51 = vpop.xlane.xlu1 %978 }
 0x2ca   : > { %v980_v52 = vsub.f32 %v974_v43, %v979_v51 }
 0x2cc   : > { %v981_v53 = vmul.f32 1.442695, %v980_v52 }
 0x2ce   : > { %1803 = vpow2.f32 %v981_v53 }
 0x2db   : > { %v1804_v54 = vpop.eup %1803 }
 0x2dc   : > { %v983_v55 = vsel %vm812_vm4, %v1804_v54, 0.0 }
 0x2dd   : > { %984 = vadd.xlane.f32.xlu1 %v983_v55 }
 0x2ee   : > { %990 = vrot.lane.b32.xlu1 %v729_v31, %s1909_s2  ;;  %v1796_v31 = vld [vmem:[%s2076_s18] sm:$0xff]   ;;  %s2309_s18 = sld [smem:[#allocation7_spill]]  ;;  %s1813_s2 = scalar_lea.vmem %s1359_s19, 128 }
 0x2ef   : > { %p1814_p1 = scmp.ne.s32.totalorder %s1359_s19, %s1813_s2  ;;  %p1821_p6 = scmp.lt.s32.totalorder %s1819_s16, %s1813_s2 }
 0x2f1   : > { %p1815_p2 = pnand %p1814_p1, %p2018_p3  ;;  %p1822_p7 = por %p1821_p6, %p1820_p5 }
 0x2f2   : > { %v821_v56 = vpop.xlane.xlu0 %820 }
 0x2f3   : > { %1805 = vrcp.f32 %v821_v56  ;;  %v1240_v56 = vsub.s32 5, %v2125_v11  ;;  %p1816_p4 = pneg %p1815_p2 }
 0x2f4   : > { %s2313_s22 = sand.u32 1, %s2309_s18  }
 0x2f5   : > { %s1340_s26 = scalar_lea.sflag [#allocation4], %s2313_s22  ;;  %p1823_p9 = pnand %p1822_p7, %p1816_p4 }
 0x300   : > { %v1806_v57 = vpop.eup %1805 }
 0x301   : > { %v823_v58 = vmul.f32 %v1806_v57, %v1802_v49 }
 0x303   : > { %1672 = vmatmul.mubr.msk.f32.vlgmr.msra.gmra.mxu1 %vm812_vm4, %v823_v58 }
 0x304   : > { %1681 = vmatprep.mubr.msk.f32.mxu1 %vm1908_vm1, %v1907_v2 }
 0x366   : > { %v985_v59 = vpop.xlane.xlu1 %984 }
 0x367   : > { %1807 = vrcp.f32 %v985_v59 }
 0x36a   : > { %v991_v60 = vpop.permute.xlu1 %990 }
 0x36b   : > { %1680 = vmatpush3.msra.mxu1 %v991_v60 }
 0x36c   : > { %1692 = vmatprep.subr.bf16.mxu1 %v1907_v2 }
 0x374   : > { %v1808_v61 = vpop.eup %1807 }
 0x375   : > { %v987_v62 = vmul.f32 %v1808_v61, %v1804_v54 }
 0x377   : > { %1682 = vmatmul.mubr.msk.f32.vlgmr.msra.gmra.mxu1 %vm812_vm4, %v987_v62  ;;  %v988_v63 = vadd.f32 %v987_v62, %v823_v58 }
 0x378   : > { %1696 = vmatprep.mubr.msk.bf16.mxu1 %vm1908_vm1, %v1907_v2  ;;  %1693 = vmatpush3.bf16.msra.mxu1 %v1795_v30 }
 0x379   : > { %v1072_v0 = vmul.f32 0.5, %v988_v63  ;;  %1694 = vmatprep.subr.bf16.mxu1 %v1907_v2 }
 0x37b   : > { %1073 = vst.msk [vmem:[%s489_s30] sm:$0xff] %vm812_vm4, %v1072_v0 }
 0x37c   : > { %1695 = vmatpush3.bf16.msra.mxu1 %v1796_v31 }
 0x3c3   : > { %v894_v1 = vpop.f32.mrf.mxu1 }
 0x3c4   : > { %898 = vst.msk [vmem:[#allocation2] sm:$0xff] %vm735_vm3, %v894_v1 }
 0x3c5   : > { %v1673_v3 = vpop.f32.mrf.mxu1 }
 0x437   : > { %v1062_v7 = vpop.f32.mrf.mxu1 }
 0x438   : > { %1067 = vrot.lane.b32.xlu1 %v1062_v7, %s1910_s24 }
 0x439   : > { %v1683_v8 = vpop.f32.mrf.mxu1 }
 0x4aa   : > { %v1068_v9 = vpop.permute.xlu1 %1067 }
 0x4ab   : > { %1071 = vst.msk [vmem:[#allocation2] sm:$0xff] %vm1070_vm5, %v1068_v9 }
 0x4b2   : > { %v1074_v10 = vld [vmem:[#allocation2] sm:$0xff] }
 0x4b3   : > { %v1075_v13 = vpack.c.bf16 %v1074_v10, %v1074_v10 }
 0x4b5   : > { %1689 = vmatmul.mubr.msk.bf16.vlgmr.msra.gmra.mxu0 %vm569_vm2, %v1075_v13 }
 0x4b6   : > { %1708 = vmatprep.mubr.msk.bf16.mxu0 %vm1908_vm1, %v1907_v2 }
 0x575   : > { %v1133_v18 = vpop.f32.mrf.mxu0 }
 0x576   : > { %v1134_v19 = vadd.f32 %v1133_v18, %v1083_v17 }
 0x577   : > { %v1690_v20 = vpop.f32.mrf.mxu0 }
 0x578   : > { %v1139_v21 = vadd.f32 %v1134_v19, %v2102_v4  ;;  %v1797_v4 = vld [vmem:[%s2081_s20 + $0x18] sm:$0xff]   ;;  %s1356_s20 = scalar_lea.hbm %s2311_s15, %s1602_s29 }
 0x579   : > { %v1136_v22 = vpop.f32.mrf.mxu0  ;;  %1701 = vmatpush3.bf16.msra.mxu0 %v1797_v4 }
 0x57a   : > { %v1140_v23 = vsel %vm569_vm2, %v1139_v21, 0.0  ;;  %1702 = vmatprep.subr.bf16.mxu0 %v1907_v2 }
 0x57b   : > { %1141 = vadd.xlane.f32.xlu1 %v1140_v23  ;;  %v1691_v24 = vpop.f32.mrf.mxu0 }
 0x57d   : > { %1703 = vmatpush3.bf16.msra.mxu0 %v1798_v32 }
 0x57e   : > { %1704 = vmatprep.subr.bf16.mxu0 %v1907_v2 }
 0x581   : > { %1705 = vmatpush3.bf16.msra.mxu0 %v1799_v45 }
 0x582   : > { %1706 = vmatprep.subr.bf16.mxu0 %v1907_v2  ;;  %v1241_v2 = vrot.slane %v2129_v14, %v1240_v56 }
 0x585   : > { %1707 = vmatpush3.bf16.msra.mxu0 %v1800_v46 }
 0x604   : > { %v1142_v25 = vpop.xlane.xlu1 %1141 }
 0x605   : > { %v1144_v26 = vmul.f32 0.03125, %v1142_v25 }
 0x607   : > { %v1145_v27 = vsub.f32 %v1139_v21, %v1144_v26 }
 0x609   : > { %v1146_v28 = vmul.f32 %v1145_v27, %v1145_v27 }
 0x60b   : > { %v1147_v29 = vsel %vm569_vm2, %v1146_v28, 0.0 }
 0x60c   : > { %1148 = vadd.xlane.f32.xlu0 %v1147_v29 }
 0x695   : > { %v1149_v33 = vpop.xlane.xlu0 %1148 }
 0x696   : > { %v1150_v34 = vmul.f32 0.03125, %v1149_v33 }
 0x698   : > { %v1151_v35 = vadd.f32 1e-05, %v1150_v34 }
 0x69a   : > { %1809 = vrsqrt.f32 %v1151_v35 }
 0x6a7   : > { %v1810_v39 = vpop.eup %1809 }
 0x6a8   : > { %v1153_v40 = vmul.f32 %v1810_v39, %v1145_v27 }
 0x6aa   : > { %v1158_v42 = vmul.f32 %v1157_v38, %v1153_v40 }
 0x6ac   : > { %v1163_v43 = vadd.f32 %v1162_v41, %v1158_v42 }
 0x6ae   : > { %v1164_v44 = vpack.c.bf16 %v1163_v43, %v1163_v43 }
 0x6b0   : > { %1697 = vmatmul.mubr.msk.bf16.vlgmr.msra.gmra.mxu1 %vm569_vm2, %v1164_v44 }
 0x770   : > { %v1222_v49 = vpop.f32.mrf.mxu1 }
 0x771   : > { %v1223_v50 = vadd.f32 %v1222_v49, %v1172_v48 }
 0x772   : > { %v1698_v51 = vpop.f32.mrf.mxu1 }
 0x773   : > { %v1228_v52 = vmax.f32 %v1223_v50, 0.0 }
 0x774   : > { %v1225_v53 = vpop.f32.mrf.mxu1 }
 0x775   : > { %v1229_v54 = vpack.c.bf16 %v1228_v52, %v1228_v52 }
 0x776   : > { %v1699_v55 = vpop.f32.mrf.mxu1 }
 0x777   : > { %1709 = vmatmul.mubr.msk.bf16.vlgmr.msra.gmra.mxu0 %vm1266_vm6, %v1229_v54 }
 0x837   : > { %v1304_v57 = vpop.f32.mrf.mxu0 }
 0x838   : > { %v1305_v58 = vadd.f32 %v1304_v57, %v1241_v2 }
 0x839   : > { %v1710_v59 = vpop.f32.mrf.mxu0 }
 0x83a   : > { %v1310_v60 = vadd.f32 %v1305_v58, %v1163_v43 }
 0x83b   : > { %v1307_v61 = vpop.f32.mrf.mxu0 }
 0x83c   : > { %v1311_v62 = vsel %vm569_vm2, %v1310_v60, 0.0 }
 0x83d   : > { %1312 = vadd.xlane.f32.xlu0 %v1311_v62  ;;  %v1711_v63 = vpop.f32.mrf.mxu0 }
 0x8c6   : > { %v1313_v0 = vpop.xlane.xlu0 %1312 }
 0x8c7   : > { %v1314_v1 = vmul.f32 0.03125, %v1313_v0 }
 0x8c9   : > { %v1315_v3 = vsub.f32 %v1310_v60, %v1314_v1 }
 0x8cb   : > { %v1316_v5 = vmul.f32 %v1315_v3, %v1315_v3 }
 0x8cd   : > { %v1317_v6 = vsel %vm569_vm2, %v1316_v5, 0.0 }
 0x8ce   : > { %1318 = vadd.xlane.f32.xlu0 %v1317_v6 }
 0x8cf   : > { %1826 = shalt.err (!%p1823_p9)
}
 0x8d0   : > { %s1827_s17 = scalar_lea.hbm %s1356_s20, 128  ;;  %s1831_s13 = scalar_lea.hbm %s2312_s27, 512 }
 0x8d1   : > { %p1828_p10 = scmp.ne.s32.totalorder %s1356_s20, %s1827_s17  ;;  %p1832_p13 = scmp.lt.s32.totalorder %s1356_s20, %s2312_s27 }
 0x8d2   : > { %p1833_p0 = scmp.lt.s32.totalorder %s1831_s13, %s1827_s17 }
 0x8d3   : > { %p1829_p11 = pnand %p1828_p10, %p2018_p3 }
 0x8d4   : > { %p1834_p1 = por %p1833_p0, %p1832_p13 }
 0x8d5   : > { %p1830_p12 = pneg %p1829_p11 }
 0x8d7   : > { %p1835_p2 = pnand %p1834_p1, %p1830_p12 }
 0x8d9   : > { %1838 = shalt.err (!%p1835_p2)
}
 0x8da   : > { %1712 = dma.vmem_to_hbm [thread:$0]  (%p2018_p3), %s1359_s19, 128, %s1356_s20, %s1340_s26   ;;  %v547_v9 = vld [vmem:[%s2086_s14 + $0x8] sm:$0x3] }
 0x8db   : > { %v1327_v10 = vrot.slane %v547_v9, %v555_v12  ;;  %v1332_v16 = vrot.slane %v547_v9, %v620_v15 }
 0x957   : > { %v1319_v14 = vpop.xlane.xlu0 %1318 }
 0x958   : > { %v1320_v7 = vmul.f32 0.03125, %v1319_v14 }
 0x95a   : > { %v1321_v8 = vadd.f32 1e-05, %v1320_v7 }
 0x95c   : > { %1811 = vrsqrt.f32 %v1321_v8 }
 0x969   : > { %v1812_v13 = vpop.eup %1811 }
 0x96a   : > { %v1323_v17 = vmul.f32 %v1812_v13, %v1315_v3 }
 0x96c   : > { %v1328_v18 = vmul.f32 %v1327_v10, %v1323_v17 }
 0x96e   : > { %v1333_v19 = vadd.f32 %v1332_v16, %v1328_v18 }
 0x970   : > { %1334 = vst.msk [vmem:[%s2092_s0] sm:$0xff] %vm569_vm2, %v1333_v19 }
 0x971 PF: > { %s2314_s11 = sld [smem:[#allocation11_spill]] }
 0x972   : > { %s2315_s12 = sld [smem:[#allocation6_spill]] }
 0x977   : > { %p1718_p3 = scmp.ge.s32.totalorder %s2314_s11, 2 }
 0x978   : > { %s1377_s29 = sand.u32 1, %s2315_s12  }
 0x979   : > { %p1715_p4 = pnand %p1718_p3, %p2027_p8  ;;  %s1378_s14 = scalar_lea.sflag [#allocation4], %s1377_s29 }
 0x97b   : > { %p1716_p5 = pneg %p1715_p4 }
 0x97d   : > { %1872 = dma.done.wait (%p1716_p5), %s1378_s14, 128  }
 0x97e   : > { %1874 = vsyncadd (%p1716_p5), %s1378_s14, 4294967168  ;;  %s24_s20 = sadd.s32 1, %s2314_s11   ;;  %s2317_s13 = sld [smem:[#allocation7_spill]] }
 0x97f   : > { %p21_p6 = scmp.ge.s32.totalorder %s24_s20, 6   ;;  %s2318_s14 = sld [smem:[#allocation8_spill]] }
 0x980   : > { %s2319_s15 = sld [smem:[#allocation16_spill]] }
 0x981   : > { %s2320_s16 = sld [smem:[#allocation9_spill]]  ;;  %23 = sbr.rel (!%p21_p6) target bundleno = 10 (0xa), region = 131 }
 0x982   : > { %s2321_s17 = sld [smem:[#allocation10_spill]] }
 0x983   : > { %s2322_s18 = sld [smem:[#allocation12_spill]] }
 0x984   : > { %s2323_s19 = sld [smem:[#allocation14_spill]] }
 0x986   :  { %1383 = vsyncpa [#allocation4], 1 }
 0x987   :  { %1385 = vsyncpa [#allocation4 + $0x1], 1 }

</bundles_post_ra>
